<compile_context>
chip_gen: v7x
topology: tpu7x:2x2x1
jax: 0.10.0
libtpu: 0.0.40
codegen_flags: <defaults>
</compile_context>

<pallas_src>
import functools

import numpy as np
import jax
import jax.numpy as jnp
from jax.experimental import pallas as pl
from jax.experimental.pallas import tpu as pltpu


_LANE = 128
_SUBLANE = 16          # bf16-friendly sublane alignment for M tiles
_CPAD = 128            # padded conv output channels (lane-dense stores)


def _round_up(x, m):
    return (x + m - 1) // m * m


@functools.lru_cache(maxsize=None)
def _vmem_capacity_bytes():
    try:
        return int(pltpu.get_tpu_info().vmem_capacity_bytes)
    except Exception:
        return 64 << 20          # conservative fallback (v7x-sized)


def _vmem_budget():
    return int(0.6 * _vmem_capacity_bytes())


def _choose_tm(m, row_bytes_buffered, resident_bytes, x_row_bytes):
    """Pick an M tile: multiple of _SUBLANE, VMEM-budgeted, >=2 grid steps.

    row_bytes_buffered: double-buffered per-row bytes of the tiled (x, out)
    blocks; resident_bytes: double-buffered bytes of the constant-index blocks.
    """
    budget = _vmem_budget()
    # K-aware row cap: target ~4 MiB per x buffer, never more than 4096 rows.
    row_cap = max(_SUBLANE, min(4096, (4 << 20) // max(x_row_bytes, 1)))
    avail = max(budget - resident_bytes, _SUBLANE * row_bytes_buffered)
    tm = min(row_cap, avail // max(row_bytes_buffered, 1))
    tm = min(tm, _round_up(m, _SUBLANE))
    tm = max(_SUBLANE, (tm // _SUBLANE) * _SUBLANE)
    # Guarantee >=2 grid steps (v7x dual-TC sharding) when there is enough work.
    # This only ever *reduces* tm, so the VMEM budget still holds.
    if m > _SUBLANE and _round_up(m, tm) // tm < 2:
        tm = max(_SUBLANE, _round_up((m + 1) // 2, _SUBLANE))
    m_pad = _round_up(m, tm)
    need = resident_bytes + tm * row_bytes_buffered
    vmem_limit = int(min(_vmem_capacity_bytes() * 3 // 4,
                         max(need + (16 << 20), 32 << 20)))
    return tm, m_pad, vmem_limit


# ----------------------------------------------------------------------------
# Pallas kernel 1: fused  out = relu?(x @ w + b)
#   x: (tm, K) bf16   w: (K, N) bf16   b: (1, N) f32   out: (tm, N)
# Grid over M only; w and b stay resident in VMEM across the grid.
# ----------------------------------------------------------------------------
def _matmul_bias_kernel(x_ref, w_ref, b_ref, o_ref, *, relu: bool):
    acc = jnp.dot(x_ref[...], w_ref[...], preferred_element_type=jnp.float32)
    acc = acc + b_ref[...]                 # (1, N) broadcasts over M, in f32
    if relu:
        acc = jnp.maximum(acc, 0.0)
    o_ref[...] = acc.astype(o_ref.dtype)


def matmul_bias(x, w, b, *, relu: bool, out_dtype):
    """x:(M,K) bf16, w:(K,N) bf16, b:(1,N) f32 -> (M,N) out_dtype."""
    m, k = x.shape
    k2, n = w.shape
    assert k == k2, (k, k2)
    assert b.shape == (1, n), b.shape

    in_sz = x.dtype.itemsize
    out_sz = jnp.dtype(out_dtype).itemsize
    x_row = k * in_sz
    row_buffered = 2 * x_row + 2 * n * out_sz          # x + out, double-buffered
    resident = 2 * (k * n * in_sz) + 2 * (n * 4)       # w + b, also double-buffered
    tm, m_pad, vmem_limit = _choose_tm(m, row_buffered, resident, x_row)

    if m_pad != m:
        x = jnp.pad(x, ((0, m_pad - m), (0, 0)))

    kernel = functools.partial(_matmul_bias_kernel, relu=relu)
    out = pl.pallas_call(
        kernel,
        out_shape=jax.ShapeDtypeStruct((m_pad, n), out_dtype),
        grid=(m_pad // tm,),
        in_specs=[
            pl.BlockSpec((tm, k), lambda i: (i, 0)),   # row tile of patches
            pl.BlockSpec((k, n), lambda i: (0, 0)),    # weights, resident
            pl.BlockSpec((1, n), lambda i: (0, 0)),    # bias, resident
        ],
        out_specs=pl.BlockSpec((tm, n), lambda i: (i, 0)),
        compiler_params=pltpu.CompilerParams(
            dimension_semantics=("parallel",),         # shard M across TCs (v7x)
            vmem_limit_bytes=vmem_limit,
        ),
    )(x, w, b)
    return out[:m] if m_pad != m else out


# ----------------------------------------------------------------------------
# Pallas kernel 2: fused conv3 (as a dense matmul) + Linear
#   out = relu(x @ w3 + b3) @ wl + bl
#   x: (tm, K1) bf16, w3: (K1, N1) bf16, wl: (N1, N2) bf16, biases f32.
# Two chained MXU matmuls, no in-kernel reshape (conv3's window selection is
# pre-folded into w3), grid over batch rows only.
# ----------------------------------------------------------------------------
def _tail_kernel(x_ref, w3_ref, b3_ref, wl_ref, bl_ref, o_ref):
    h = jnp.dot(x_ref[...], w3_ref[...], preferred_element_type=jnp.float32)
    h = jnp.maximum(h + b3_ref[...], 0.0)
    o = jnp.dot(h.astype(jnp.bfloat16), wl_ref[...],
                preferred_element_type=jnp.float32)
    o_ref[...] = (o + bl_ref[...]).astype(o_ref.dtype)


def tail_fused(x, w3, b3, wl, bl, *, out_dtype=jnp.float32):
    m, k1 = x.shape
    _, n1 = w3.shape
    _, n2 = wl.shape
    assert b3.shape == (1, n1) and bl.shape == (1, n2)

    in_sz = x.dtype.itemsize
    out_sz = jnp.dtype(out_dtype).itemsize
    x_row = k1 * in_sz
    row_buffered = 2 * x_row + 2 * n2 * out_sz
    resident = 2 * (k1 * n1 * in_sz + n1 * 4 + n1 * n2 * in_sz + n2 * 4)
    tm, m_pad, vmem_limit = _choose_tm(m, row_buffered, resident, x_row)

    if m_pad != m:
        x = jnp.pad(x, ((0, m_pad - m), (0, 0)))

    out = pl.pallas_call(
        _tail_kernel,
        out_shape=jax.ShapeDtypeStruct((m_pad, n2), out_dtype),
        grid=(m_pad // tm,),
        in_specs=[
            pl.BlockSpec((tm, k1), lambda i: (i, 0)),
            pl.BlockSpec((k1, n1), lambda i: (0, 0)),
            pl.BlockSpec((1, n1), lambda i: (0, 0)),
            pl.BlockSpec((n1, n2), lambda i: (0, 0)),
            pl.BlockSpec((1, n2), lambda i: (0, 0)),
        ],
        out_specs=pl.BlockSpec((tm, n2), lambda i: (i, 0)),
        compiler_params=pltpu.CompilerParams(
            dimension_semantics=("parallel",),
            vmem_limit_bytes=vmem_limit,
        ),
    )(x, w3, b3, wl, bl)
    return out[:m] if m_pad != m else out


# ----------------------------------------------------------------------------
# im2col glue (plain JAX): NHWC -> patch matrix with column order (kh, kw, cin)
# ----------------------------------------------------------------------------
def im2col_nhwc(x, k, s):
    n, h, w, c = x.shape
    oh = (h - k) // s + 1
    ow = (w - k) // s + 1
    cols = []
    for i in range(k):
        for j in range(k):
            cols.append(x[:, i:i + s * oh:s, j:j + s * ow:s, :])  # (n,oh,ow,c)
    p = jnp.stack(cols, axis=3)                  # (n, oh, ow, k*k, c)
    return p.reshape(n * oh * ow, k * k * c), oh, ow


def conv2d_relu(x_nhwc, w_mat, b_row, *, k, stride):
    """Conv (valid, square kernel) + ReLU; output channels padded to 128."""
    n = x_nhwc.shape[0]
    patches, oh, ow = im2col_nhwc(x_nhwc, k, stride)   # (n*oh*ow, k*k*Cin_real)
    y = matmul_bias(patches, w_mat, b_row, relu=True, out_dtype=jnp.bfloat16)
    return y.reshape(n, oh, ow, w_mat.shape[1])


# ----------------------------------------------------------------------------
# Parameter construction (PyTorch shapes) + one-time layout preprocessing
# ----------------------------------------------------------------------------
def conv_size_out(size, k, s):
    return (size - (k - 1) - 1) // s + 1


def conv_layers_size_out(size):
    size = conv_size_out(size, 8, 4)
    size = conv_size_out(size, 4, 2)
    size = conv_size_out(size, 3, 1)
    return size


def init_raw_params(d, h, w, key):
    convw = conv_layers_size_out(w)
    convh = conv_layers_size_out(h)
    lin_in = convw * convh * 64
    ks = jax.random.split(key, 8)

    def rnd(k_, shape, fan_in):
        bound = 1.0 / float(fan_in) ** 0.5
        return jax.random.uniform(k_, shape, jnp.float32, -bound, bound)

    return {
        "w1": rnd(ks[0], (32, d, 8, 8), d * 8 * 8),
        "b1": rnd(ks[1], (32,), d * 8 * 8),
        "w2": rnd(ks[2], (64, 32, 4, 4), 32 * 4 * 4),
        "b2": rnd(ks[3], (64,), 32 * 4 * 4),
        "w3": rnd(ks[4], (64, 64, 3, 3), 64 * 3 * 3),
        "b3": rnd(ks[5], (64,), 64 * 3 * 3),
        "wl": rnd(ks[6], (512, lin_in), lin_in),
        "bl": rnd(ks[7], (512,), lin_in),
    }


def _dense_conv_stride1_matrix(w_oihw, ih, iw):
    """Fold a stride-1 VALID conv into a dense (ih*iw*ic, oh*ow*oc) matrix.

    Rows follow the NHWC flatten (y, x, c_in) of the input; columns follow the
    NHWC flatten (oy, ox, c_out) of the output."""
    w = np.asarray(w_oihw, np.float32)
    oc, ic, kh, kw = w.shape
    oh, ow = ih - kh + 1, iw - kw + 1
    big = np.zeros((ih, iw, ic, oh, ow, oc), np.float32)
    for oy in range(oh):
        for ox in range(ow):
            for i in range(kh):
                for j in range(kw):
                    big[oy + i, ox + j, :, oy, ox, :] = w[:, :, i, j].T
    return big.reshape(ih * iw * ic, oh * ow * oc)


def preprocess_params(raw, h, w):
    """One-time weight layout work (hoisted out of the forward path)."""
    h1, w1 = conv_size_out(h, 8, 4), conv_size_out(w, 8, 4)
    h2, w2 = conv_size_out(h1, 4, 2), conv_size_out(w1, 4, 2)
    h3, w3 = conv_size_out(h2, 3, 1), conv_size_out(w2, 3, 1)

    def conv_w(w_oihw):
        oc, ic, kh, kw = w_oihw.shape
        wp = jnp.pad(w_oihw, ((0, _CPAD - oc), (0, 0), (0, 0), (0, 0)))
        wp = jnp.transpose(wp, (2, 3, 1, 0))            # (kh, kw, cin_real, CPAD)
        return wp.reshape(kh * kw * ic, _CPAD).astype(jnp.bfloat16)

    def conv_b(b):
        return jnp.pad(b, (0, _CPAD - b.shape[0])).reshape(1, _CPAD).astype(jnp.float32)

    p = {
        "w1m": conv_w(raw["w1"]), "b1m": conv_b(raw["b1"]),
        "w2m": conv_w(raw["w2"]), "b2m": conv_b(raw["b2"]),
    }

    # Linear weight: fold the NCHW flatten permutation in; rows follow the NHWC
    # flatten (oy, ox, c) of the *real* 64 conv3 channels (no padding in K).
    wl = raw["wl"].reshape(512, 64, h3, w3)
    wlm = jnp.transpose(wl, (2, 3, 1, 0)).reshape(h3 * w3 * 64, 512).astype(jnp.bfloat16)
    blm = raw["bl"].reshape(1, 512).astype(jnp.float32)
    p["wlm"], p["blm"] = wlm, blm

    # Fuse conv3 + Linear when conv3's spatial output is small enough that the
    # densified conv3 weight stays tiny (it is (h2*w2*64, h3*w3*64)).
    fused_tail = (h3 * w3) <= 16
    if fused_tail:
        p["w3big"] = jnp.asarray(_dense_conv_stride1_matrix(raw["w3"], h2, w2),
                                 jnp.bfloat16)
        p["b3big"] = jnp.tile(raw["b3"], h3 * w3).reshape(1, -1).astype(jnp.float32)
    else:
        p["w3m"], p["b3m"] = conv_w(raw["w3"]), conv_b(raw["b3"])
    return p, fused_tail


# ----------------------------------------------------------------------------
# Forward pass (matches ConvNet.forward: returns (features, state))
# ----------------------------------------------------------------------------
def convnet_forward(params, x_nchw, state=None, *, fused_tail=True):
    # bf16 cast *before* the layout transpose (halves the transpose's HBM bytes).
    x = jnp.transpose(x_nchw.astype(jnp.bfloat16), (0, 2, 3, 1))   # NCHW -> NHWC
    y = conv2d_relu(x, params["w1m"], params["b1m"], k=8, stride=4)
    # Slice back to real channels so the zero padding never enters the next K.
    y = conv2d_relu(y[..., :32], params["w2m"], params["b2m"], k=4, stride=2)
    n = y.shape[0]
    if fused_tail:
        flat2 = y[..., :64].reshape(n, -1)       # NHWC-flattened conv2 activation
        out = tail_fused(flat2, params["w3big"], params["b3big"],
                         params["wlm"], params["blm"], out_dtype=jnp.float32)
    else:
        y3 = conv2d_relu(y[..., :64], params["w3m"], params["b3m"], k=3, stride=1)
        flat3 = y3[..., :64].reshape(n, -1)
        out = matmul_bias(flat3, params["wlm"], params["blm"],
                          relu=False, out_dtype=jnp.float32)
    return out, state


# ----------------------------------------------------------------------------
# Pure-JAX reference (f32) for correctness check
# ----------------------------------------------------------------------------
def reference_forward(raw, x_nchw):
    y = x_nchw.astype(jnp.float32)
    for wkey, bkey, s in (("w1", "b1", 4), ("w2", "b2", 2), ("w3", "b3", 1)):
        y = jax.lax.conv_general_dilated(
            y, raw[wkey], window_strides=(s, s), padding="VALID",
            dimension_numbers=("NCHW", "OIHW", "NCHW"))
        y = jnp.maximum(y + raw[bkey].reshape(1, -1, 1, 1), 0.0)
    flat = y.reshape(y.shape[0], -1)
    return flat @ raw["wl"].T + raw["bl"]


if __name__ == "__main__":
    # Small shapes consistent with the module: batch=2, d=4 channels,
    # spatial 44x44 (44 -> 10 -> 4 -> 2 through the 8/4/3 conv stack).
    B, d, h, w = 2, 4, 44, 44

    raw = init_raw_params(d, h, w, jax.random.PRNGKey(0))
    params, fused_tail = preprocess_params(raw, h, w)

    x = jax.random.normal(jax.random.PRNGKey(0), (B, d, h, w), jnp.float32)

    fwd = jax.jit(functools.partial(convnet_forward, fused_tail=fused_tail))
    out, state = fwd(params, x)
    out = jax.block_until_ready(out)
    assert out.shape == (B, 512), out.shape
    assert state is None

    # Loose tolerance: bf16 MXU inputs with f32 accumulation.
    ref = reference_forward(raw, x)
    err = float(jnp.max(jnp.abs(out - ref)))
    scale = float(jnp.max(jnp.abs(ref)))
    assert err <= 0.05 * scale + 1e-2, (err, scale)

    print("KERNEL_OK")
</pallas_src>

<mosaic_0001>
module attributes {stable_mosaic.version = 11 : i64} {
  func.func @_matmul_bias_kernel(%arg0: i32, %arg1: memref<112x256xbf16, #tpu.memory_space<vmem>>, %arg2: memref<256x128xbf16, #tpu.memory_space<vmem>>, %arg3: memref<1x128xf32, #tpu.memory_space<vmem>>, %arg4: memref<112x128xbf16, #tpu.memory_space<vmem>>) attributes {dimension_semantics = [#tpu.dimension_semantics<parallel>], iteration_bounds = array<i64: 2>, scalar_prefetch = 0 : i64, scratch_operands = 0 : i64, tpu.core_type = #tpu.core_type<tc>, window_params = [{transform_indices = @transform_0, window_bounds = array<i64: 112, 256>}, {pipeline_mode = #tpu.pipeline_mode<synchronous>, transform_indices = @transform_1, window_bounds = array<i64: 256, 128>}, {pipeline_mode = #tpu.pipeline_mode<synchronous>, transform_indices = @transform_2, window_bounds = array<i64: 1, 128>}, {transform_indices = @transform_3, window_bounds = array<i64: 112, 128>}]} {
    %c0 = arith.constant 0 : index
    %c0_0 = arith.constant 0 : index
    %0 = vector.load %arg1[%c0, %c0_0] : memref<112x256xbf16, #tpu.memory_space<vmem>>, vector<112x256xbf16>
    %c0_1 = arith.constant 0 : index
    %c0_2 = arith.constant 0 : index
    %1 = vector.load %arg2[%c0_1, %c0_2] : memref<256x128xbf16, #tpu.memory_space<vmem>>, vector<256x128xbf16>
    %cst = arith.constant dense<0.000000e+00> : vector<112x128xf32>
    %2 = tpu.matmul %0, %1, %cst {dimension_numbers = #tpu.dot_dimension_numbers<[1], [0], [0], [1], [0, 0, 1, 1], [], []>} : vector<112x256xbf16>, vector<256x128xbf16>, vector<112x128xf32> -> vector<112x128xf32>
    %c0_3 = arith.constant 0 : index
    %c0_4 = arith.constant 0 : index
    %3 = vector.load %arg3[%c0_3, %c0_4] : memref<1x128xf32, #tpu.memory_space<vmem>>, vector<1x128xf32>
    %4 = vector.broadcast %3 : vector<1x128xf32> to vector<112x128xf32>
    %5 = arith.addf %2, %4 : vector<112x128xf32>
    %cst_5 = arith.constant 0.000000e+00 : f32
    %6 = vector.broadcast %cst_5 : f32 to vector<112x128xf32>
    %7 = arith.maximumf %5, %6 : vector<112x128xf32>
    %8 = arith.truncf %7 : vector<112x128xf32> to vector<112x128xbf16>
    %c0_6 = arith.constant 0 : index
    %c0_7 = arith.constant 0 : index
    %9 = vector.load %arg4[%c0_6, %c0_7] : memref<112x128xbf16, #tpu.memory_space<vmem>>, vector<112x128xbf16>
    tpu.vector_store %arg4[%c0_6, %c0_7], %8 {strides = array<i32>} : memref<112x128xbf16, #tpu.memory_space<vmem>>, vector<112x128xbf16>,
    return
  }
  func.func @transform_0(%arg0: i32) -> (i32, i32) {
    %c0_i32 = arith.constant 0 : i32
    %c0_i32_0 = arith.constant 0 : i32
    return %arg0, %c0_i32 : i32, i32
  }
  func.func @transform_1(%arg0: i32) -> (i32, i32) {
    %c0_i32 = arith.constant 0 : i32
    %c0_i32_0 = arith.constant 0 : i32
    %c0_i32_1 = arith.constant 0 : i32
    return %c0_i32, %c0_i32_0 : i32, i32
  }
  func.func @transform_2(%arg0: i32) -> (i32, i32) {
    %c0_i32 = arith.constant 0 : i32
    %c0_i32_0 = arith.constant 0 : i32
    %c0_i32_1 = arith.constant 0 : i32
    return %c0_i32, %c0_i32_0 : i32, i32
  }
  func.func @transform_3(%arg0: i32) -> (i32, i32) {
    %c0_i32 = arith.constant 0 : i32
    %c0_i32_0 = arith.constant 0 : i32
    return %arg0, %c0_i32 : i32, i32
  }
}

module attributes {stable_mosaic.version = 11 : i64} {
  func.func @_matmul_bias_kernel(%arg0: i32, %arg1: memref<16x512xbf16, #tpu.memory_space<vmem>>, %arg2: memref<512x128xbf16, #tpu.memory_space<vmem>>, %arg3: memref<1x128xf32, #tpu.memory_space<vmem>>, %arg4: memref<16x128xbf16, #tpu.memory_space<vmem>>) attributes {dimension_semantics = [#tpu.dimension_semantics<parallel>], iteration_bounds = array<i64: 2>, scalar_prefetch = 0 : i64, scratch_operands = 0 : i64, tpu.core_type = #tpu.core_type<tc>, window_params = [{transform_indices = @transform_0, window_bounds = array<i64: 16, 512>}, {pipeline_mode = #tpu.pipeline_mode<synchronous>, transform_indices = @transform_1, window_bounds = array<i64: 512, 128>}, {pipeline_mode = #tpu.pipeline_mode<synchronous>, transform_indices = @transform_2, window_bounds = array<i64: 1, 128>}, {transform_indices = @transform_3, window_bounds = array<i64: 16, 128>}]} {
    %c0 = arith.constant 0 : index
    %c0_0 = arith.constant 0 : index
    %0 = vector.load %arg1[%c0, %c0_0] : memref<16x512xbf16, #tpu.memory_space<vmem>>, vector<16x512xbf16>
    %c0_1 = arith.constant 0 : index
    %c0_2 = arith.constant 0 : index
    %1 = vector.load %arg2[%c0_1, %c0_2] : memref<512x128xbf16, #tpu.memory_space<vmem>>, vector<512x128xbf16>
    %cst = arith.constant dense<0.000000e+00> : vector<16x128xf32>
    %2 = tpu.matmul %0, %1, %cst {dimension_numbers = #tpu.dot_dimension_numbers<[1], [0], [0], [1], [0, 0, 1, 1], [], []>} : vector<16x512xbf16>, vector<512x128xbf16>, vector<16x128xf32> -> vector<16x128xf32>
    %c0_3 = arith.constant 0 : index
    %c0_4 = arith.constant 0 : index
    %3 = vector.load %arg3[%c0_3, %c0_4] : memref<1x128xf32, #tpu.memory_space<vmem>>, vector<1x128xf32>
    %4 = vector.broadcast %3 : vector<1x128xf32> to vector<16x128xf32>
    %5 = arith.addf %2, %4 : vector<16x128xf32>
    %cst_5 = arith.constant 0.000000e+00 : f32
    %6 = vector.broadcast %cst_5 : f32 to vector<16x128xf32>
    %7 = arith.maximumf %5, %6 : vector<16x128xf32>
    %8 = arith.truncf %7 : vector<16x128xf32> to vector<16x128xbf16>
    %c0_6 = arith.constant 0 : index
    %c0_7 = arith.constant 0 : index
    %9 = vector.load %arg4[%c0_6, %c0_7] : memref<16x128xbf16, #tpu.memory_space<vmem>>, vector<16x128xbf16>
    tpu.vector_store %arg4[%c0_6, %c0_7], %8 {strides = array<i32>} : memref<16x128xbf16, #tpu.memory_space<vmem>>, vector<16x128xbf16>,
    return
  }
  func.func @transform_0(%arg0: i32) -> (i32, i32) {
    %c0_i32 = arith.constant 0 : i32
    %c0_i32_0 = arith.constant 0 : i32
    return %arg0, %c0_i32 : i32, i32
  }
  func.func @transform_1(%arg0: i32) -> (i32, i32) {
    %c0_i32 = arith.constant 0 : i32
    %c0_i32_0 = arith.constant 0 : i32
    %c0_i32_1 = arith.constant 0 : i32
    return %c0_i32, %c0_i32_0 : i32, i32
  }
  func.func @transform_2(%arg0: i32) -> (i32, i32) {
    %c0_i32 = arith.constant 0 : i32
    %c0_i32_0 = arith.constant 0 : i32
    %c0_i32_1 = arith.constant 0 : i32
    return %c0_i32, %c0_i32_0 : i32, i32
  }
  func.func @transform_3(%arg0: i32) -> (i32, i32) {
    %c0_i32 = arith.constant 0 : i32
    %c0_i32_0 = arith.constant 0 : i32
    return %arg0, %c0_i32 : i32, i32
  }
}

module attributes {stable_mosaic.version = 11 : i64} {
  func.func @_tail_kernel(%arg0: i32, %arg1: memref<16x1024xbf16, #tpu.memory_space<vmem>>, %arg2: memref<1024x256xbf16, #tpu.memory_space<vmem>>, %arg3: memref<1x256xf32, #tpu.memory_space<vmem>>, %arg4: memref<256x512xbf16, #tpu.memory_space<vmem>>, %arg5: memref<1x512xf32, #tpu.memory_space<vmem>>, %arg6: memref<16x512xf32, #tpu.memory_space<vmem>>) attributes {dimension_semantics = [#tpu.dimension_semantics<parallel>], iteration_bounds = array<i64: 1>, scalar_prefetch = 0 : i64, scratch_operands = 0 : i64, tpu.core_type = #tpu.core_type<tc>, window_params = [{transform_indices = @transform_0, window_bounds = array<i64: 16, 1024>}, {pipeline_mode = #tpu.pipeline_mode<synchronous>, transform_indices = @transform_1, window_bounds = array<i64: 1024, 256>}, {pipeline_mode = #tpu.pipeline_mode<synchronous>, transform_indices = @transform_2, window_bounds = array<i64: 1, 256>}, {pipeline_mode = #tpu.pipeline_mode<synchronous>, transform_indices = @transform_3, window_bounds = array<i64: 256, 512>}, {pipeline_mode = #tpu.pipeline_mode<synchronous>, transform_indices = @transform_4, window_bounds = array<i64: 1, 512>}, {transform_indices = @transform_5, window_bounds = array<i64: 16, 512>}]} {
    %c0 = arith.constant 0 : index
    %c0_0 = arith.constant 0 : index
    %0 = vector.load %arg1[%c0, %c0_0] : memref<16x1024xbf16, #tpu.memory_space<vmem>>, vector<16x1024xbf16>
    %c0_1 = arith.constant 0 : index
    %c0_2 = arith.constant 0 : index
    %1 = vector.load %arg2[%c0_1, %c0_2] : memref<1024x256xbf16, #tpu.memory_space<vmem>>, vector<1024x256xbf16>
    %cst = arith.constant dense<0.000000e+00> : vector<16x256xf32>
    %2 = tpu.matmul %0, %1, %cst {dimension_numbers = #tpu.dot_dimension_numbers<[1], [0], [0], [1], [0, 0, 1, 1], [], []>} : vector<16x1024xbf16>, vector<1024x256xbf16>, vector<16x256xf32> -> vector<16x256xf32>
    %c0_3 = arith.constant 0 : index
    %c0_4 = arith.constant 0 : index
    %3 = vector.load %arg3[%c0_3, %c0_4] : memref<1x256xf32, #tpu.memory_space<vmem>>, vector<1x256xf32>
    %4 = vector.broadcast %3 : vector<1x256xf32> to vector<16x256xf32>
    %5 = arith.addf %2, %4 : vector<16x256xf32>
    %cst_5 = arith.constant 0.000000e+00 : f32
    %6 = vector.broadcast %cst_5 : f32 to vector<16x256xf32>
    %7 = arith.maximumf %5, %6 : vector<16x256xf32>
    %8 = arith.truncf %7 : vector<16x256xf32> to vector<16x256xbf16>
    %c0_6 = arith.constant 0 : index
    %c0_7 = arith.constant 0 : index
    %9 = vector.load %arg4[%c0_6, %c0_7] : memref<256x512xbf16, #tpu.memory_space<vmem>>, vector<256x512xbf16>
    %cst_8 = arith.constant dense<0.000000e+00> : vector<16x512xf32>
    %10 = tpu.matmul %8, %9, %cst_8 {dimension_numbers = #tpu.dot_dimension_numbers<[1], [0], [0], [1], [0, 0, 1, 1], [], []>} : vector<16x256xbf16>, vector<256x512xbf16>, vector<16x512xf32> -> vector<16x512xf32>
    %c0_9 = arith.constant 0 : index
    %c0_10 = arith.constant 0 : index
    %11 = vector.load %arg5[%c0_9, %c0_10] : memref<1x512xf32, #tpu.memory_space<vmem>>, vector<1x512xf32>
    %12 = vector.broadcast %11 : vector<1x512xf32> to vector<16x512xf32>
    %13 = arith.addf %10, %12 : vector<16x512xf32>
    %c0_11 = arith.constant 0 : index
    %c0_12 = arith.constant 0 : index
    %14 = vector.load %arg6[%c0_11, %c0_12] : memref<16x512xf32, #tpu.memory_space<vmem>>, vector<16x512xf32>
    tpu.vector_store %arg6[%c0_11, %c0_12], %13 {strides = array<i32>} : memref<16x512xf32, #tpu.memory_space<vmem>>, vector<16x512xf32>,
    return
  }
  func.func @transform_0(%arg0: i32) -> (i32, i32) {
    %c0_i32 = arith.constant 0 : i32
    %c0_i32_0 = arith.constant 0 : i32
    return %arg0, %c0_i32 : i32, i32
  }
  func.func @transform_1(%arg0: i32) -> (i32, i32) {
    %c0_i32 = arith.constant 0 : i32
    %c0_i32_0 = arith.constant 0 : i32
    %c0_i32_1 = arith.constant 0 : i32
    return %c0_i32, %c0_i32_0 : i32, i32
  }
  func.func @transform_2(%arg0: i32) -> (i32, i32) {
    %c0_i32 = arith.constant 0 : i32
    %c0_i32_0 = arith.constant 0 : i32
    %c0_i32_1 = arith.constant 0 : i32
    return %c0_i32, %c0_i32_0 : i32, i32
  }
  func.func @transform_3(%arg0: i32) -> (i32, i32) {
    %c0_i32 = arith.constant 0 : i32
    %c0_i32_0 = arith.constant 0 : i32
    %c0_i32_1 = arith.constant 0 : i32
    return %c0_i32, %c0_i32_0 : i32, i32
  }
  func.func @transform_4(%arg0: i32) -> (i32, i32) {
    %c0_i32 = arith.constant 0 : i32
    %c0_i32_0 = arith.constant 0 : i32
    %c0_i32_1 = arith.constant 0 : i32
    return %c0_i32, %c0_i32_0 : i32, i32
  }
  func.func @transform_5(%arg0: i32) -> (i32, i32) {
    %c0_i32 = arith.constant 0 : i32
    %c0_i32_0 = arith.constant 0 : i32
    return %arg0, %c0_i32 : i32, i32
  }
}

</mosaic_0001>

<bundles_post_ra>
// kernel: convnet_forward.3
= control target key start
LH: loop header
LB: loop body
LE: loop exit
PB: predicated region body
PF: predicated region fallthrough
CT: control target
= control target key end

     0   :  { %s884_s12 = smov 0   ;;  %s997_s0 = inlined_call_operand.vmem [shape: bf16[224,256], index: 0, kind: input, shape index: {}]   ;;  %s998_s1 = inlined_call_operand.vmem [shape: bf16[256,128], index: 1, kind: input, shape index: {}]   ;;  %s999_s2 = inlined_call_operand.vmem [shape: f32[1,128], index: 2, kind: input, shape index: {}]   ;;  %s1000_s3 = inlined_call_operand.vmem [shape: bf16[224,128], index: 3, kind: output, shape index: {}]  }
   0x1 LB: > { %s626_s13 = sadd.s32 4294967295, %s862_s12   ;;  %p630_p0 = scmp.ge.s32.totalorder %s862_s12, 1  ;;  %s862_s12 = sphi %s884_s12, %s13_s12  }
   0x2   : > { %p139_p1 = scmp.lt.s32.totalorder %s862_s12, 3 }
   0x4   : > { %p140_p2 = pnand %p630_p0, %p139_p1 }
   0x5   : > { %v819_v0 = vld [vmem:[%s998_s1 + $0x40] sm:$0xff] (!%p140_p2)   ;;  %s164_s16 = smul.u32 (!%p140_p2), 14, %s626_s13  ;;  %v821_v2 = vld [vmem:[%s998_s1 + $0x48] sm:$0xff] (!%p140_p2)   ;;  %v823_v4 = vld [vmem:[%s998_s1 + $0x50] sm:$0xff] (!%p140_p2)  }
   0x6   : > { %143 = sbr.rel (%p140_p2) target bundleno = 286 (0x11e), region = 32  ;;  %v820_v1 = vld [vmem:[%s998_s1] sm:$0xff] (!%p140_p2)   ;;  %737 = vmatprep.subr.bf16.mxu0 (!%p140_p2), %v819_v0  ;;  %795 = vmatprep.subr.bf16.mxu1 (!%p140_p2), %v819_v0  ;;  %v822_v3 = vld [vmem:[%s998_s1 + $0x8] sm:$0xff] (!%p140_p2)   ;;  %v824_v5 = vld [vmem:[%s998_s1 + $0x10] sm:$0xff] (!%p140_p2)  }
   0x7   : > { %738 = vmatpush3.bf16.msra.mxu0 (!%p140_p2), %v820_v1  ;;  %803 = vmatpush3.bf16.msra.mxu1 (!%p140_p2), %v820_v1  ;;  %p165_p3 = scmp.lt.s32.totalorder (!%p140_p2), %s164_s16, 27  ;;  %v825_v6 = vld [vmem:[%s998_s1 + $0x58] sm:$0xff] (!%p140_p2)   ;;  %v827_v8 = vld [vmem:[%s998_s1 + $0x60] sm:$0xff] (!%p140_p2)   ;;  %v829_v10 = vld [vmem:[%s998_s1 + $0x68] sm:$0xff] (!%p140_p2)  }
   0x8   : > { %739 = vmatprep.subr.bf16.mxu0 (!%p140_p2), %v821_v2  ;;  %796 = vmatprep.subr.bf16.mxu1 (!%p140_p2), %v821_v2  ;;  %v826_v7 = vld [vmem:[%s998_s1 + $0x18] sm:$0xff] (!%p140_p2)   ;;  %v828_v9 = vld [vmem:[%s998_s1 + $0x20] sm:$0xff] (!%p140_p2)   ;;  %v830_v13 = vld [vmem:[%s998_s1 + $0x28] sm:$0xff] (!%p140_p2)  }
   0x9   : > { %v831_v14 = vld [vmem:[%s998_s1 + $0x70] sm:$0xff] (!%p140_p2)   ;;  %v833_v16 = vld [vmem:[%s998_s1 + $0x78] sm:$0xff] (!%p140_p2)   ;;  %v965_v32 = vld [vmem:[%s999_s2] ss:$0 sm:$0xff] (!%p140_p2) }
   0xa   : > { %v832_v15 = vld [vmem:[%s998_s1 + $0x30] sm:$0xff] (!%p140_p2)   ;;  %v834_v17 = vld [vmem:[%s998_s1 + $0x38] sm:$0xff] (!%p140_p2)  }
   0xb   : > { %740 = vmatpush3.bf16.msra.mxu0 (!%p140_p2), %v822_v3  ;;  %804 = vmatpush3.bf16.msra.mxu1 (!%p140_p2), %v822_v3 }
   0xc   : > { %741 = vmatprep.subr.bf16.mxu0 (!%p140_p2), %v823_v4  ;;  %797 = vmatprep.subr.bf16.mxu1 (!%p140_p2), %v823_v4 }
   0xd   : > { %s1002_s16 = smov (!%p165_p3, %s164_s16), 27 }
   0xe   : > { %s681_s4 = sshll.u32 %s1002_s16, 3  ;;  %s633_s28 = sshll.u32 %s1002_s16, 2 }
   0xf   : > { %742 = vmatpush3.bf16.msra.mxu0 %v824_v5  ;;  %805 = vmatpush3.bf16.msra.mxu1 %v824_v5  ;;  %s925_s9 = scalar_lea.vmem %s997_s0, %s681_s4  ;;  %s975_s4 = scalar_lea.vmem %s1000_s3, %s633_s28 }
  0x10   : > { %743 = vmatprep.subr.bf16.mxu0 %v825_v6  ;;  %798 = vmatprep.subr.bf16.mxu1 %v825_v6  ;;  %v837_v11 = vld [vmem:[%s925_s9 + $0x4] ss:$8 sps:$4 sm:$0xff]   ;;  %v835_v18 = vld [vmem:[%s925_s9] ss:$8 sps:$4 sm:$0xff]   ;;  %v841_v20 = vld [vmem:[%s925_s9 + $0x14] ss:$8 sps:$4 sm:$0xff]  }
  0x11   : > { %v840_v12 = vld [vmem:[%s925_s9 + $0x44] ss:$8 sps:$4 sm:$0xff]   ;;  %429 = vmatprep.mubr.bf16.mxu0 %v837_v11  ;;  %v838_v19 = vld [vmem:[%s925_s9 + $0x40] ss:$8 sps:$4 sm:$0xff]   ;;  %v844_v21 = vld [vmem:[%s925_s9 + $0x54] ss:$8 sps:$4 sm:$0xff]  }
  0x12   : > { %461 = vmatprep.mubr.bf16.mxu1 %v840_v12  ;;  %v843_v22 = vld [vmem:[%s925_s9 + $0x10] ss:$8 sps:$4 sm:$0xff]   ;;  %v847_v24 = vld [vmem:[%s925_s9 + $0x24] ss:$8 sps:$4 sm:$0xff]   ;;  %v849_v26 = vld [vmem:[%s925_s9 + $0x20] ss:$8 sps:$4 sm:$0xff]  }
  0x13   : > { %744 = vmatpush3.bf16.msra.mxu0 %v826_v7  ;;  %806 = vmatpush3.bf16.msra.mxu1 %v826_v7  ;;  %v846_v23 = vld [vmem:[%s925_s9 + $0x50] ss:$8 sps:$4 sm:$0xff]   ;;  %v850_v25 = vld [vmem:[%s925_s9 + $0x64] ss:$8 sps:$4 sm:$0xff]   ;;  %v852_v27 = vld [vmem:[%s925_s9 + $0x60] ss:$8 sps:$4 sm:$0xff]  }
  0x14   : > { %745 = vmatprep.subr.bf16.mxu0 %v827_v8  ;;  %799 = vmatprep.subr.bf16.mxu1 %v827_v8  ;;  %v853_v28 = vld [vmem:[%s925_s9 + $0x34] ss:$8 sps:$4 sm:$0xff]   ;;  %v855_v29 = vld [vmem:[%s925_s9 + $0x30] ss:$8 sps:$4 sm:$0xff]  }
  0x17   : > { %746 = vmatpush3.bf16.msra.mxu0 %v828_v9  ;;  %807 = vmatpush3.bf16.msra.mxu1 %v828_v9 }
  0x18   : > { %747 = vmatprep.subr.bf16.mxu0 %v829_v10  ;;  %800 = vmatprep.subr.bf16.mxu1 %v829_v10 }
  0x1b   : > { %748 = vmatpush3.bf16.msra.mxu0 %v830_v13  ;;  %808 = vmatpush3.bf16.msra.mxu1 %v830_v13 }
  0x1c   : > { %749 = vmatprep.subr.bf16.mxu0 %v831_v14  ;;  %801 = vmatprep.subr.bf16.mxu1 %v831_v14 }
  0x1f   : > { %750 = vmatpush3.bf16.msra.mxu0 %v832_v15  ;;  %809 = vmatpush3.bf16.msra.mxu1 %v832_v15 }
  0x20   : > { %751 = vmatprep.subr.bf16.mxu0 %v833_v16  ;;  %802 = vmatprep.subr.bf16.mxu1 %v833_v16 }
  0x23   : > { %752 = vmatpush3.bf16.msra.mxu0 %v834_v17  ;;  %810 = vmatpush3.bf16.msra.mxu1 %v834_v17 }
  0x26   : > { %430 = vmatmul.mubr.bf16.vlgmr.msra.gmra.mrb[0].mxu0 %v835_v18  ;;  %462 = vmatmul.mubr.bf16.vlgmr.msra.gmra.mrb[0].mxu1 %v838_v19 }
  0x27   : > { %437 = vmatprep.mubr.bf16.mxu0 %v841_v20  ;;  %469 = vmatprep.mubr.bf16.mxu1 %v844_v21 }
  0x2e   : > { %438 = vmatmul.mubr.bf16.gmra.mrb[4].mxu0 %v843_v22  ;;  %470 = vmatmul.mubr.bf16.gmra.mrb[4].mxu1 %v846_v23 }
  0x2f   : > { %445 = vmatprep.mubr.bf16.mxu0 %v847_v24  ;;  %477 = vmatprep.mubr.bf16.mxu1 %v850_v25 }
  0x36   : > { %446 = vmatmul.mubr.bf16.gmra.mrb[8].mxu0 %v849_v26  ;;  %478 = vmatmul.mubr.bf16.gmra.mrb[8].mxu1 %v852_v27 }
  0x37   : > { %453 = vmatprep.mubr.bf16.mxu0 %v853_v28 }
  0x3e   : > { %454 = vmatmul.mubr.bf16.gmra.mrb[12].mxu0 %v855_v29 }
  0xf9   : > { %v753_v30 = vpop.f32.mrb[0].mxu0  ;;  %v777_v31 = vpop.f32.mrb[0].mxu1 }
  0xfa   : > { %v754_v33 = vpop.f32.mrb[1].mxu0  ;;  %v778_v34 = vpop.f32.mrb[1].mxu1 }
  0xfb   : > { %v755_v35 = vadd.f32 %v754_v33, %v753_v30  ;;  %v756_v36 = vpop.f32.mrb[2].mxu0  ;;  %v779_v37 = vadd.f32 %v778_v34, %v777_v31  ;;  %v780_v38 = vpop.f32.mrb[2].mxu1 }
  0xfc   : > { %v757_v39 = vpop.f32.mrb[3].mxu0  ;;  %v781_v40 = vpop.f32.mrb[3].mxu1 }
  0xfd   : > { %v432_v41 = vadd.f32 %v755_v35, %v965_v32  ;;  %v758_v42 = vadd.f32 %v757_v39, %v756_v36  ;;  %v464_v43 = vadd.f32 %v779_v37, %v965_v32  ;;  %v782_v44 = vadd.f32 %v781_v40, %v780_v38 }
  0xff   : > { %v435_v45 = vadd.f32 %v758_v42, %v965_v32  ;;  %v494_v46 = vmax.f32 %v464_v43, 0.0  ;;  %v467_v47 = vadd.f32 %v782_v44, %v965_v32  ;;  %v486_v48 = vmax.f32 %v432_v41, 0.0 }
 0x101   : > { %v487_v49 = vmax.f32 %v435_v45, 0.0  ;;  %v759_v50 = vpop.f32.mrb[4].mxu0  ;;  %v495_v51 = vmax.f32 %v467_v47, 0.0  ;;  %v783_v52 = vpop.f32.mrb[4].mxu1 }
 0x102   : > { %v760_v53 = vpop.f32.mrb[5].mxu0  ;;  %v784_v54 = vpop.f32.mrb[5].mxu1 }
 0x103   : > { %v699_v55 = vpack.c.bf16 %v487_v49, %v486_v48  ;;  %v719_v56 = vpack.c.bf16 %v495_v51, %v494_v46  ;;  %v761_v57 = vadd.f32 %v760_v53, %v759_v50  ;;  %v762_v58 = vpop.f32.mrb[6].mxu0  ;;  %v785_v59 = vadd.f32 %v784_v54, %v783_v52  ;;  %v786_v60 = vpop.f32.mrb[6].mxu1 }
 0x104   : > { %v763_v61 = vpop.f32.mrb[7].mxu0  ;;  %v787_v62 = vpop.f32.mrb[7].mxu1 }
 0x105   : > { %700 = vst [vmem:[%s975_s4] sm:$0xff] %v699_v55   ;;  %734 = vst [vmem:[%s975_s4 + $0x20] sm:$0xff] %v719_v56   ;;  %v440_v63 = vadd.f32 %v761_v57, %v965_v32  ;;  %v764_v0 = vadd.f32 %v763_v61, %v762_v58  ;;  %v472_v1 = vadd.f32 %v785_v59, %v965_v32 }
 0x106   : > { %v788_v2 = vadd.f32 %v787_v62, %v786_v60 }
 0x107   : > { %v443_v3 = vadd.f32 %v764_v0, %v965_v32  ;;  %v496_v4 = vmax.f32 %v472_v1, 0.0  ;;  %v488_v6 = vmax.f32 %v440_v63, 0.0 }
 0x108   : > { %v475_v5 = vadd.f32 %v788_v2, %v965_v32 }
 0x109   : > { %v489_v7 = vmax.f32 %v443_v3, 0.0  ;;  %v765_v8 = vpop.f32.mrb[8].mxu0  ;;  %v789_v10 = vpop.f32.mrb[8].mxu1 }
 0x10a   : > { %v497_v9 = vmax.f32 %v475_v5, 0.0  ;;  %v766_v11 = vpop.f32.mrb[9].mxu0  ;;  %v790_v12 = vpop.f32.mrb[9].mxu1 }
 0x10b   : > { %v704_v13 = vpack.c.bf16 %v489_v7, %v488_v6  ;;  %v767_v15 = vadd.f32 %v766_v11, %v765_v8  ;;  %v768_v16 = vpop.f32.mrb[10].mxu0  ;;  %v791_v17 = vadd.f32 %v790_v12, %v789_v10  ;;  %v792_v18 = vpop.f32.mrb[10].mxu1 }
 0x10c   : > { %v724_v14 = vpack.c.bf16 %v497_v9, %v496_v4  ;;  %v769_v19 = vpop.f32.mrb[11].mxu0  ;;  %v793_v20 = vpop.f32.mrb[11].mxu1 }
 0x10d   : > { %731 = vst [vmem:[%s975_s4 + $0x8] sm:$0xff] %v704_v13   ;;  %v448_v21 = vadd.f32 %v767_v15, %v965_v32  ;;  %v770_v22 = vadd.f32 %v769_v19, %v768_v16  ;;  %v480_v23 = vadd.f32 %v791_v17, %v965_v32  ;;  %v794_v24 = vadd.f32 %v793_v20, %v792_v18 }
 0x10e   : > { %735 = vst [vmem:[%s975_s4 + $0x28] sm:$0xff] %v724_v14  }
 0x10f   : > { %v451_v25 = vadd.f32 %v770_v22, %v965_v32  ;;  %v498_v26 = vmax.f32 %v480_v23, 0.0  ;;  %v483_v27 = vadd.f32 %v794_v24, %v965_v32  ;;  %v490_v28 = vmax.f32 %v448_v21, 0.0 }
 0x111   : > { %v491_v29 = vmax.f32 %v451_v25, 0.0  ;;  %v771_v30 = vpop.f32.mrb[12].mxu0  ;;  %v499_v31 = vmax.f32 %v483_v27, 0.0 }
 0x112   : > { %v772_v33 = vpop.f32.mrb[13].mxu0 }
 0x113   : > { %v709_v34 = vpack.c.bf16 %v491_v29, %v490_v28  ;;  %v729_v35 = vpack.c.bf16 %v499_v31, %v498_v26  ;;  %v773_v36 = vadd.f32 %v772_v33, %v771_v30  ;;  %v774_v37 = vpop.f32.mrb[14].mxu0 }
 0x114   : > { %v775_v38 = vpop.f32.mrb[15].mxu0 }
 0x115   : > { %732 = vst [vmem:[%s975_s4 + $0x10] sm:$0xff] %v709_v34   ;;  %736 = vst [vmem:[%s975_s4 + $0x30] sm:$0xff] %v729_v35   ;;  %v456_v39 = vadd.f32 %v773_v36, %v965_v32  ;;  %v776_v40 = vadd.f32 %v775_v38, %v774_v37 }
 0x117   : > { %v459_v41 = vadd.f32 %v776_v40, %v965_v32  ;;  %v492_v42 = vmax.f32 %v456_v39, 0.0 }
 0x119   : > { %v493_v43 = vmax.f32 %v459_v41, 0.0 }
 0x11b   : > { %v714_v44 = vpack.c.bf16 %v493_v43, %v492_v42 }
 0x11d   : > { %733 = vst [vmem:[%s975_s4 + $0x18] sm:$0xff] %v714_v44  }
 0x11e PF: > { %s13_s12 = sadd.s32 1, %s862_s12  }
 0x11f   : > { %p10_p4 = scmp.ge.s32.totalorder %s13_s12, 4  }
 0x121   :  { %12 = sbr.rel (!%p10_p4) target bundleno = 1 (0x1), region = 62 }

// kernel: convnet_forward.4
= control target key start
LH: loop header
LB: loop body
LE: loop exit
PB: predicated region body
PF: predicated region fallthrough
CT: control target
= control target key end

     0   :  { %s792_s12 = smov 0   ;;  %s914_s0 = inlined_call_operand.vmem [shape: bf16[32,512], index: 0, kind: input, shape index: {}]   ;;  %s915_s1 = inlined_call_operand.vmem [shape: bf16[512,128], index: 1, kind: input, shape index: {}]   ;;  %s916_s2 = inlined_call_operand.vmem [shape: f32[1,128], index: 2, kind: input, shape index: {}]   ;;  %s917_s3 = inlined_call_operand.vmem [shape: bf16[32,128], index: 3, kind: output, shape index: {}]  }
   0x1 LB: > { %s615_s13 = sadd.s32 4294967295, %s770_s12   ;;  %p619_p0 = scmp.ge.s32.totalorder %s770_s12, 1  ;;  %s770_s12 = sphi %s792_s12, %s13_s12  }
   0x2   : > { %p139_p1 = scmp.lt.s32.totalorder %s770_s12, 3 }
   0x4   : > { %p140_p2 = pnand %p619_p0, %p139_p1 }
   0x5   : > { %v726_v0 = vld [vmem:[%s915_s1 + $0x40] sm:$0xff] (!%p140_p2)   ;;  %v730_v4 = vld [vmem:[%s915_s1 + $0x48] sm:$0xff] (!%p140_p2)   ;;  %v734_v8 = vld [vmem:[%s915_s1 + $0x50] sm:$0xff] (!%p140_p2)   ;;  %s620_s21 = sshll.u32 (!%p140_p2), %s615_s13, 1 }
   0x6   : > { %143 = sbr.rel (%p140_p2) target bundleno = 265 (0x109), region = 32  ;;  %v727_v1 = vld [vmem:[%s915_s1 + $0xc0] sm:$0xff] (!%p140_p2)   ;;  %674 = vmatprep.subr.bf16.mxu0 (!%p140_p2), %v726_v0  ;;  %v731_v5 = vld [vmem:[%s915_s1 + $0xc8] sm:$0xff] (!%p140_p2)   ;;  %v735_v9 = vld [vmem:[%s915_s1 + $0xd0] sm:$0xff] (!%p140_p2)   ;;  %p165_p3 = scmp.lt.s32.totalorder (!%p140_p2), %s620_s21, 3 }
   0x7   : > { %v728_v2 = vld [vmem:[%s915_s1] sm:$0xff] (!%p140_p2)   ;;  %696 = vmatprep.subr.bf16.mxu1 (!%p140_p2), %v727_v1  ;;  %v732_v6 = vld [vmem:[%s915_s1 + $0x8] sm:$0xff] (!%p140_p2)   ;;  %v736_v10 = vld [vmem:[%s915_s1 + $0x10] sm:$0xff] (!%p140_p2)  }
   0x8   : > { %v729_v3 = vld [vmem:[%s915_s1 + $0x80] sm:$0xff] (!%p140_p2)   ;;  %675 = vmatpush3.bf16.msra.mxu0 (!%p140_p2), %v728_v2  ;;  %v733_v7 = vld [vmem:[%s915_s1 + $0x88] sm:$0xff] (!%p140_p2)   ;;  %v737_v11 = vld [vmem:[%s915_s1 + $0x90] sm:$0xff] (!%p140_p2)  }
   0x9   : > { %697 = vmatpush3.bf16.msra.mxu1 (!%p140_p2), %v729_v3  ;;  %676 = vmatprep.subr.bf16.mxu0 (!%p140_p2), %v730_v4  ;;  %v738_v12 = vld [vmem:[%s915_s1 + $0x58] sm:$0xff] (!%p140_p2)   ;;  %v742_v16 = vld [vmem:[%s915_s1 + $0x60] sm:$0xff] (!%p140_p2)   ;;  %v746_v20 = vld [vmem:[%s915_s1 + $0x68] sm:$0xff] (!%p140_p2)  }
   0xa   : > { %698 = vmatprep.subr.bf16.mxu1 (!%p140_p2), %v731_v5  ;;  %v739_v13 = vld [vmem:[%s915_s1 + $0xd8] sm:$0xff] (!%p140_p2)   ;;  %v743_v17 = vld [vmem:[%s915_s1 + $0xe0] sm:$0xff] (!%p140_p2)   ;;  %v747_v21 = vld [vmem:[%s915_s1 + $0xe8] sm:$0xff] (!%p140_p2)  }
   0xb   : > { %v740_v14 = vld [vmem:[%s915_s1 + $0x18] sm:$0xff] (!%p140_p2)   ;;  %v744_v18 = vld [vmem:[%s915_s1 + $0x20] sm:$0xff] (!%p140_p2)   ;;  %v748_v22 = vld [vmem:[%s915_s1 + $0x28] sm:$0xff] (!%p140_p2)  }
   0xc   : > { %677 = vmatpush3.bf16.msra.mxu0 (!%p140_p2), %v732_v6  ;;  %v741_v15 = vld [vmem:[%s915_s1 + $0x98] sm:$0xff] (!%p140_p2)   ;;  %v745_v19 = vld [vmem:[%s915_s1 + $0xa0] sm:$0xff] (!%p140_p2)   ;;  %v749_v23 = vld [vmem:[%s915_s1 + $0xa8] sm:$0xff] (!%p140_p2)  }
   0xd   : > { %699 = vmatpush3.bf16.msra.mxu1 %v733_v7  ;;  %678 = vmatprep.subr.bf16.mxu0 %v734_v8  ;;  %s919_s21 = smov (!%p165_p3, %s620_s21), 3  ;;  %v750_v24 = vld [vmem:[%s915_s1 + $0x70] sm:$0xff]   ;;  %v754_v28 = vld [vmem:[%s915_s1 + $0x78] sm:$0xff]   ;;  %v625_v38 = vld [vmem:[%s916_s2] ss:$0 sm:$0xff] }
   0xe   : > { %700 = vmatprep.subr.bf16.mxu1 %v735_v9  ;;  %v751_v25 = vld [vmem:[%s915_s1 + $0xf0] sm:$0xff]   ;;  %s666_s18 = sshll.u32 %s919_s21, 4  ;;  %v755_v29 = vld [vmem:[%s915_s1 + $0xf8] sm:$0xff]   ;;  %s624_s7 = sshll.u32 %s919_s21, 2 }
   0xf   : > { %v752_v26 = vld [vmem:[%s915_s1 + $0x30] sm:$0xff]   ;;  %s169_s28 = scalar_lea.vmem %s914_s0, %s666_s18  ;;  %v756_v30 = vld [vmem:[%s915_s1 + $0x38] sm:$0xff]   ;;  %s175_s10 = scalar_lea.vmem %s917_s3, %s624_s7 }
  0x10   : > { %679 = vmatpush3.bf16.msra.mxu0 %v736_v10  ;;  %v753_v27 = vld [vmem:[%s915_s1 + $0xb0] sm:$0xff]   ;;  %v757_v31 = vld [vmem:[%s915_s1 + $0xb8] sm:$0xff]  }
  0x11   : > { %701 = vmatpush3.bf16.msra.mxu1 %v737_v11  ;;  %680 = vmatprep.subr.bf16.mxu0 %v738_v12  ;;  %v758_v32 = vld [vmem:[%s169_s28] ss:$16 sps:$4 sm:$0xff]   ;;  %v760_v33 = vld [vmem:[%s169_s28 + $0x4] ss:$16 sps:$4 sm:$0xff]   ;;  %v761_v34 = vld [vmem:[%s169_s28 + $0x8] ss:$16 sps:$4 sm:$0xff]  }
  0x12   : > { %702 = vmatprep.subr.bf16.mxu1 %v739_v13  ;;  %v763_v35 = vld [vmem:[%s169_s28 + $0xc] ss:$16 sps:$4 sm:$0xff]   ;;  %497 = vmatprep.mubr.bf16.mxu0 %v760_v33 }
  0x13   : > { %538 = vmatprep.mubr.bf16.mxu1 %v763_v35 }
  0x14   : > { %681 = vmatpush3.bf16.msra.mxu0 %v740_v14 }
  0x15   : > { %703 = vmatpush3.bf16.msra.mxu1 %v741_v15  ;;  %682 = vmatprep.subr.bf16.mxu0 %v742_v16 }
  0x16   : > { %704 = vmatprep.subr.bf16.mxu1 %v743_v17 }
  0x18   : > { %683 = vmatpush3.bf16.msra.mxu0 %v744_v18 }
  0x19   : > { %705 = vmatpush3.bf16.msra.mxu1 %v745_v19  ;;  %684 = vmatprep.subr.bf16.mxu0 %v746_v20 }
  0x1a   : > { %706 = vmatprep.subr.bf16.mxu1 %v747_v21 }
  0x1c   : > { %685 = vmatpush3.bf16.msra.mxu0 %v748_v22 }
  0x1d   : > { %707 = vmatpush3.bf16.msra.mxu1 %v749_v23  ;;  %686 = vmatprep.subr.bf16.mxu0 %v750_v24 }
  0x1e   : > { %708 = vmatprep.subr.bf16.mxu1 %v751_v25 }
  0x20   : > { %687 = vmatpush3.bf16.msra.mxu0 %v752_v26 }
  0x21   : > { %709 = vmatpush3.bf16.msra.mxu1 %v753_v27  ;;  %688 = vmatprep.subr.bf16.mxu0 %v754_v28 }
  0x22   : > { %710 = vmatprep.subr.bf16.mxu1 %v755_v29 }
  0x24   : > { %689 = vmatpush3.bf16.msra.mxu0 %v756_v30 }
  0x25   : > { %711 = vmatpush3.bf16.msra.mxu1 %v757_v31 }
  0x27   : > { %498 = vmatmul.mubr.bf16.vlgmr.msra.gmra.mrb[0].mxu0 %v758_v32 }
  0x28   : > { %539 = vmatmul.mubr.bf16.vlgmr.msra.gmra.mrb[0].mxu1 %v761_v34 }
  0xfa   : > { %v690_v36 = vpop.f32.mrb[0].mxu0 }
  0xfb   : > { %v712_v37 = vpop.f32.mrb[0].mxu1  ;;  %v691_v39 = vpop.f32.mrb[1].mxu0 }
  0xfc   : > { %v692_v40 = vadd.f32 %v691_v39, %v690_v36  ;;  %v713_v41 = vpop.f32.mrb[1].mxu1  ;;  %v693_v42 = vpop.f32.mrb[2].mxu0 }
  0xfd   : > { %v714_v43 = vadd.f32 %v713_v41, %v712_v37  ;;  %v715_v44 = vpop.f32.mrb[2].mxu1  ;;  %v694_v45 = vpop.f32.mrb[3].mxu0 }
  0xfe   : > { %v500_v46 = vadd.f32 %v692_v40, %v625_v38  ;;  %v695_v47 = vadd.f32 %v694_v45, %v693_v42  ;;  %v716_v48 = vpop.f32.mrb[3].mxu1 }
  0xff   : > { %v717_v49 = vadd.f32 %v716_v48, %v715_v44 }
 0x100   : > { %v541_v50 = vadd.f32 %v714_v43, %v500_v46  ;;  %v503_v51 = vadd.f32 %v695_v47, %v625_v38 }
 0x102   : > { %v544_v52 = vadd.f32 %v717_v49, %v503_v51  ;;  %v547_v53 = vmax.f32 %v541_v50, 0.0 }
 0x104   : > { %v548_v54 = vmax.f32 %v544_v52, 0.0 }
 0x106   : > { %v672_v55 = vpack.c.bf16 %v548_v54, %v547_v53 }
 0x108   : > { %673 = vst [vmem:[%s175_s10] sm:$0xff] %v672_v55  }
 0x109 PF: > { %s13_s12 = sadd.s32 1, %s770_s12  }
 0x10a   : > { %p10_p4 = scmp.ge.s32.totalorder %s13_s12, 4  }
 0x10c   :  { %12 = sbr.rel (!%p10_p4) target bundleno = 1 (0x1), region = 62 }

// kernel: convnet_forward.5
= control target key start
LH: loop header
LB: loop body
LE: loop exit
PB: predicated region body
PF: predicated region fallthrough
CT: control target
= control target key end

     0   :  { %s2736_s1 = inlined_call_operand.vmem [shape: bf16[1024,256], index: 1, kind: input, shape index: {}]   ;;  %s2737_s0 = inlined_call_operand.vmem [shape: bf16[16,1024], index: 0, kind: input, shape index: {}]   ;;  %s2738_s3 = inlined_call_operand.vmem [shape: bf16[256,512], index: 3, kind: input, shape index: {}]   ;;  %s2739_s2 = inlined_call_operand.vmem [shape: f32[1,256], index: 2, kind: input, shape index: {}]   ;;  %s2740_s4 = inlined_call_operand.vmem [shape: f32[1,512], index: 4, kind: input, shape index: {}]   ;;  %s2741_s5 = inlined_call_operand.vmem [shape: f32[16,512], index: 5, kind: output, shape index: {}]  }
   0x1   :  { %v1746_v0 = vld [vmem:[%s2736_s1 + $0x104] ss:$8 sps:$4 sm:$0xff]   ;;  %v1748_v1 = vld [vmem:[%s2736_s1 + $0x100] ss:$8 sps:$4 sm:$0xff]   ;;  %v1749_v2 = vld [vmem:[%s2736_s1 + $0x114] ss:$8 sps:$4 sm:$0xff]  }
   0x2   :  { %891 = vmatprep.subr.bf16.mxu0 %v1746_v0  ;;  %v1751_v3 = vld [vmem:[%s2736_s1 + $0x110] ss:$8 sps:$4 sm:$0xff]   ;;  %v1752_v4 = vld [vmem:[%s2736_s1 + $0x124] ss:$8 sps:$4 sm:$0xff]   ;;  %v1754_v5 = vld [vmem:[%s2736_s1 + $0x120] ss:$8 sps:$4 sm:$0xff]  }
   0x3   :  { %892 = vmatpush1.bf16.msra.mxu0 %v1748_v1  ;;  %v1755_v6 = vld [vmem:[%s2736_s1 + $0x134] ss:$8 sps:$4 sm:$0xff]   ;;  %v1757_v7 = vld [vmem:[%s2736_s1 + $0x130] ss:$8 sps:$4 sm:$0xff]   ;;  %v1758_v8 = vld [vmem:[%s2736_s1 + $0x144] ss:$8 sps:$4 sm:$0xff]  }
   0x4   :  { %893 = vmatprep.subr.bf16.mxu0 %v1749_v2  ;;  %v1760_v9 = vld [vmem:[%s2736_s1 + $0x140] ss:$8 sps:$4 sm:$0xff]   ;;  %v1761_v10 = vld [vmem:[%s2736_s1 + $0x154] ss:$8 sps:$4 sm:$0xff]   ;;  %v1763_v11 = vld [vmem:[%s2736_s1 + $0x150] ss:$8 sps:$4 sm:$0xff]  }
   0x5   :  { %v1764_v12 = vld [vmem:[%s2736_s1 + $0x164] ss:$8 sps:$4 sm:$0xff]   ;;  %v1766_v16 = vld [vmem:[%s2736_s1 + $0x160] ss:$8 sps:$4 sm:$0xff]   ;;  %v1767_v17 = vld [vmem:[%s2736_s1 + $0x174] ss:$8 sps:$4 sm:$0xff]  }
   0x6   :  { %v2106_v13 = vld [vmem:[%s2737_s0 + $0x8] sm:$0xff]  ;;  %v1769_v18 = vld [vmem:[%s2736_s1 + $0x170] ss:$8 sps:$4 sm:$0xff]   ;;  %v1773_v21 = vld [vmem:[%s2736_s1 + $0x194] ss:$8 sps:$4 sm:$0xff]  }
   0x7   :  { %894 = vmatpush1.bf16.msra.mxu0 %v1751_v3  ;;  %v2111_v14 = vld [vmem:[%s2737_s0 + $0x28] sm:$0xff]  ;;  %v1775_v22 = vld [vmem:[%s2736_s1 + $0x190] ss:$8 sps:$4 sm:$0xff]   ;;  %v1779_v25 = vld [vmem:[%s2736_s1 + $0x1b4] ss:$8 sps:$4 sm:$0xff]  }
   0x8   :  { %895 = vmatprep.subr.bf16.mxu0 %v1752_v4  ;;  %v1533_v15 = vcombine.high %v2106_v13, %v2111_v14  ;;  %v1770_v19 = vld [vmem:[%s2736_s1 + $0x184] ss:$8 sps:$4 sm:$0xff]   ;;  %v1772_v20 = vld [vmem:[%s2736_s1 + $0x180] ss:$8 sps:$4 sm:$0xff]   ;;  %v1781_v26 = vld [vmem:[%s2736_s1 + $0x1b0] ss:$8 sps:$4 sm:$0xff]   ;;  %v1532_v50 = vcombine.low %v2106_v13, %v2111_v14 }
   0x9   :  { %v1776_v23 = vld [vmem:[%s2736_s1 + $0x1a4] ss:$8 sps:$4 sm:$0xff]   ;;  %v1778_v24 = vld [vmem:[%s2736_s1 + $0x1a0] ss:$8 sps:$4 sm:$0xff]   ;;  %v1845_v30 = vld [vmem:[%s2736_s1 + $0x14] ss:$8 sps:$4 sm:$0xff]  }
   0xa   :  { %923 = vmatprep.mubr.bf16.mxu0 %v1533_v15  ;;  %v1839_v27 = vld [vmem:[%s2736_s1 + $0x4] ss:$8 sps:$4 sm:$0xff]   ;;  %v1841_v28 = vld [vmem:[%s2736_s1] ss:$8 sps:$4 sm:$0xff]   ;;  %v1847_v31 = vld [vmem:[%s2736_s1 + $0x10] ss:$8 sps:$4 sm:$0xff]  }
   0xb   :  { %896 = vmatpush1.bf16.msra.mxu0 %v1754_v5  ;;  %v1782_v29 = vld [vmem:[%s2736_s1 + $0x1c4] ss:$8 sps:$4 sm:$0xff]   ;;  %848 = vmatprep.subr.bf16.mxu1 %v1839_v27  ;;  %v1784_v32 = vld [vmem:[%s2736_s1 + $0x1c0] ss:$8 sps:$4 sm:$0xff]   ;;  %v1785_v33 = vld [vmem:[%s2736_s1 + $0x1d4] ss:$8 sps:$4 sm:$0xff]  }
   0xc   :  { %897 = vmatprep.subr.bf16.mxu0 %v1755_v6  ;;  %849 = vmatpush1.bf16.msra.mxu1 %v1841_v28  ;;  %v1851_v34 = vld [vmem:[%s2736_s1 + $0x24] ss:$8 sps:$4 sm:$0xff]   ;;  %v1853_v35 = vld [vmem:[%s2736_s1 + $0x20] ss:$8 sps:$4 sm:$0xff]   ;;  %v1787_v36 = vld [vmem:[%s2736_s1 + $0x1d0] ss:$8 sps:$4 sm:$0xff]  }
   0xd   :  { %850 = vmatprep.subr.bf16.mxu1 %v1845_v30  ;;  %v1857_v37 = vld [vmem:[%s2736_s1 + $0x34] ss:$8 sps:$4 sm:$0xff]   ;;  %v1788_v38 = vld [vmem:[%s2736_s1 + $0x1e4] ss:$8 sps:$4 sm:$0xff]   ;;  %v1859_v39 = vld [vmem:[%s2736_s1 + $0x30] ss:$8 sps:$4 sm:$0xff]  }
   0xe   :  { %v1863_v40 = vld [vmem:[%s2736_s1 + $0x44] ss:$8 sps:$4 sm:$0xff]   ;;  %v1790_v41 = vld [vmem:[%s2736_s1 + $0x1e0] ss:$8 sps:$4 sm:$0xff]   ;;  %v1791_v42 = vld [vmem:[%s2736_s1 + $0x1f4] ss:$8 sps:$4 sm:$0xff]  }
   0xf   :  { %898 = vmatpush1.bf16.msra.mxu0 %v1757_v7  ;;  %v1865_v43 = vld [vmem:[%s2736_s1 + $0x40] ss:$8 sps:$4 sm:$0xff]   ;;  %v1793_v44 = vld [vmem:[%s2736_s1 + $0x1f0] ss:$8 sps:$4 sm:$0xff]   ;;  %v1869_v45 = vld [vmem:[%s2736_s1 + $0x54] ss:$8 sps:$4 sm:$0xff]  }
  0x10   :  { %899 = vmatprep.subr.bf16.mxu0 %v1758_v8  ;;  %851 = vmatpush1.bf16.msra.mxu1 %v1847_v31  ;;  %v1796_v46 = vld [vmem:[%s2736_s1 + $0x204] ss:$8 sps:$4 sm:$0xff]   ;;  %v2211_v47 = vld [vmem:[%s2737_s0 + $0x10] sm:$0xff]  ;;  %v1794_v52 = vld [vmem:[%s2736_s1 + $0x200] ss:$8 sps:$4 sm:$0xff]  }
  0x11   :  { %852 = vmatprep.subr.bf16.mxu1 %v1851_v34  ;;  %v2216_v48 = vld [vmem:[%s2737_s0 + $0x30] sm:$0xff]  ;;  %v1875_v51 = vld [vmem:[%s2736_s1 + $0x64] ss:$8 sps:$4 sm:$0xff]   ;;  %v1877_v55 = vld [vmem:[%s2736_s1 + $0x60] ss:$8 sps:$4 sm:$0xff]  }
  0x12   :  { %v1871_v49 = vld [vmem:[%s2736_s1 + $0x50] ss:$8 sps:$4 sm:$0xff]   ;;  %v1535_v53 = vcombine.high %v2211_v47, %v2216_v48  ;;  %v1799_v54 = vld [vmem:[%s2736_s1 + $0x214] ss:$8 sps:$4 sm:$0xff]   ;;  %v1802_v58 = vld [vmem:[%s2736_s1 + $0x224] ss:$8 sps:$4 sm:$0xff]  }
  0x13   :  { %900 = vmatpush1.bf16.msra.mxu0 %v1760_v9  ;;  %v1881_v56 = vld [vmem:[%s2736_s1 + $0x74] ss:$8 sps:$4 sm:$0xff]   ;;  %v1797_v57 = vld [vmem:[%s2736_s1 + $0x210] ss:$8 sps:$4 sm:$0xff]   ;;  %v1887_v60 = vld [vmem:[%s2736_s1 + $0x84] ss:$8 sps:$4 sm:$0xff]  }
  0x14   :  { %901 = vmatprep.subr.bf16.mxu0 %v1761_v10  ;;  %853 = vmatpush1.bf16.msra.mxu1 %v1853_v35  ;;  %v1883_v59 = vld [vmem:[%s2736_s1 + $0x70] ss:$8 sps:$4 sm:$0xff]   ;;  %v1800_v61 = vld [vmem:[%s2736_s1 + $0x220] ss:$8 sps:$4 sm:$0xff]   ;;  %v1805_v62 = vld [vmem:[%s2736_s1 + $0x234] ss:$8 sps:$4 sm:$0xff]  }
  0x15   :  { %854 = vmatprep.subr.bf16.mxu1 %v1857_v37  ;;  %v1889_v63 = vld [vmem:[%s2736_s1 + $0x80] ss:$8 sps:$4 sm:$0xff]   ;;  %v1893_v0 = vld [vmem:[%s2736_s1 + $0x94] ss:$8 sps:$4 sm:$0xff]   ;;  %v1803_v1 = vld [vmem:[%s2736_s1 + $0x230] ss:$8 sps:$4 sm:$0xff]  }
  0x16   :  { %v1808_v2 = vld [vmem:[%s2736_s1 + $0x244] ss:$8 sps:$4 sm:$0xff]   ;;  %v1895_v3 = vld [vmem:[%s2736_s1 + $0x90] ss:$8 sps:$4 sm:$0xff]   ;;  %v1806_v5 = vld [vmem:[%s2736_s1 + $0x240] ss:$8 sps:$4 sm:$0xff]  }
  0x17   :  { %902 = vmatpush1.bf16.msra.mxu0 %v1763_v11  ;;  %v1899_v4 = vld [vmem:[%s2736_s1 + $0xa4] ss:$8 sps:$4 sm:$0xff]   ;;  %v1811_v6 = vld [vmem:[%s2736_s1 + $0x254] ss:$8 sps:$4 sm:$0xff]   ;;  %v1901_v7 = vld [vmem:[%s2736_s1 + $0xa0] ss:$8 sps:$4 sm:$0xff]  }
  0x18   :  { %903 = vmatprep.subr.bf16.mxu0 %v1764_v12  ;;  %855 = vmatpush1.bf16.msra.mxu1 %v1859_v39  ;;  %v1905_v8 = vld [vmem:[%s2736_s1 + $0xb4] ss:$8 sps:$4 sm:$0xff]   ;;  %v1809_v9 = vld [vmem:[%s2736_s1 + $0x250] ss:$8 sps:$4 sm:$0xff]   ;;  %v1814_v10 = vld [vmem:[%s2736_s1 + $0x264] ss:$8 sps:$4 sm:$0xff]  }
  0x19   :  { %856 = vmatprep.subr.bf16.mxu1 %v1863_v40  ;;  %v1907_v11 = vld [vmem:[%s2736_s1 + $0xb0] ss:$8 sps:$4 sm:$0xff]   ;;  %v20_v12 = vld [vmem:[%s2737_s0] sm:$0xff]  ;;  %v1929_v27 = vld [vmem:[%s2736_s1 + $0xf4] ss:$8 sps:$4 sm:$0xff]  }
  0x1a   :  { %v24_v13 = vld [vmem:[%s2737_s0 + $0x20] sm:$0xff]  ;;  %v1821_v28 = vld [vmem:[%s2736_s1 + $0x290] ss:$8 sps:$4 sm:$0xff]  }
  0x1b   :  { %904 = vmatpush1.bf16.msra.mxu0 %v1766_v16  ;;  %v1911_v14 = vld [vmem:[%s2736_s1 + $0xc4] ss:$8 sps:$4 sm:$0xff]   ;;  %v1531_v15 = vcombine.high %v20_v12, %v24_v13  ;;  %v1812_v16 = vld [vmem:[%s2736_s1 + $0x260] ss:$8 sps:$4 sm:$0xff]   ;;  %v1931_v30 = vld [vmem:[%s2736_s1 + $0xf0] ss:$8 sps:$4 sm:$0xff]   ;;  %v1530_v34 = vcombine.low %v20_v12, %v24_v13 }
  0x1c   :  { %905 = vmatprep.subr.bf16.mxu0 %v1767_v17  ;;  %857 = vmatpush1.bf16.msra.mxu1 %v1865_v43  ;;  %v1817_v17 = vld [vmem:[%s2736_s1 + $0x274] ss:$8 sps:$4 sm:$0xff]   ;;  %v1827_v35 = vld [vmem:[%s2736_s1 + $0x2b0] ss:$8 sps:$4 sm:$0xff]   ;;  %v1872_v13 = vld [vmem:[%s2736_s1 + $0x340] ss:$8 sps:$4 sm:$0xff]  }
  0x1d   :  { %858 = vmatprep.subr.bf16.mxu1 %v1869_v45  ;;  %880 = vmatprep.mubr.bf16.mxu1 %v1531_v15  ;;  %v1940_v31 = vld [vmem:[%s2738_s3 + $0x4] ss:$16 sps:$4 sm:$0xff]   ;;  %v1941_v39 = vld [vmem:[%s2738_s3 + $0x20] ss:$16 sps:$4 sm:$0xff]  }
  0x1e   :  { %v1943_v37 = vld [vmem:[%s2738_s3 + $0x24] ss:$16 sps:$4 sm:$0xff]   ;;  %v1944_v43 = vld [vmem:[%s2738_s3 + $0x40] ss:$16 sps:$4 sm:$0xff]  }
  0x1f   :  { %906 = vmatpush1.bf16.msra.mxu0 %v1769_v18  ;;  %v1913_v18 = vld [vmem:[%s2736_s1 + $0xc0] ss:$8 sps:$4 sm:$0xff]   ;;  %v1946_v40 = vld [vmem:[%s2738_s3 + $0x44] ss:$16 sps:$4 sm:$0xff]   ;;  %v1833_v45 = vld [vmem:[%s2736_s1 + $0x2d0] ss:$8 sps:$4 sm:$0xff]  }
  0x20   :  { %907 = vmatprep.subr.bf16.mxu0 %v1770_v19  ;;  %859 = vmatpush1.bf16.msra.mxu1 %v1871_v49  ;;  %v1917_v19 = vld [vmem:[%s2736_s1 + $0xd4] ss:$8 sps:$4 sm:$0xff]   ;;  %v1947_v49 = vld [vmem:[%s2738_s3 + $0x60] ss:$16 sps:$4 sm:$0xff]  }
  0x21   :  { %860 = vmatprep.subr.bf16.mxu1 %v1875_v51  ;;  %v1836_v51 = vld [vmem:[%s2736_s1 + $0x2e0] ss:$8 sps:$4 sm:$0xff]   ;;  %v1970_v12 = vld [vmem:[%s2738_s3 + $0x144] ss:$16 sps:$4 sm:$0xff]  }
  0x22   :  { %v1968_v15 = vld [vmem:[%s2738_s3 + $0x140] ss:$16 sps:$4 sm:$0xff]  }
  0x23   :  { %908 = vmatpush1.bf16.msra.mxu0 %v1772_v20  ;;  %v1815_v20 = vld [vmem:[%s2736_s1 + $0x270] ss:$8 sps:$4 sm:$0xff]  }
  0x24   :  { %909 = vmatprep.subr.bf16.mxu0 %v1773_v21  ;;  %861 = vmatpush1.bf16.msra.mxu1 %v1877_v55  ;;  %v1820_v21 = vld [vmem:[%s2736_s1 + $0x284] ss:$8 sps:$4 sm:$0xff]   ;;  %v1842_v55 = vld [vmem:[%s2736_s1 + $0x2f0] ss:$8 sps:$4 sm:$0xff]  }
  0x25   :  { %862 = vmatprep.subr.bf16.mxu1 %v1881_v56  ;;  %v1850_v56 = vld [vmem:[%s2736_s1 + $0x304] ss:$8 sps:$4 sm:$0xff]  }
  0x27   :  { %910 = vmatpush1.bf16.msra.mxu0 %v1775_v22  ;;  %v1919_v22 = vld [vmem:[%s2736_s1 + $0xd0] ss:$8 sps:$4 sm:$0xff]  }
  0x28   :  { %911 = vmatprep.subr.bf16.mxu0 %v1776_v23  ;;  %863 = vmatpush1.bf16.msra.mxu1 %v1883_v59  ;;  %v1923_v23 = vld [vmem:[%s2736_s1 + $0xe4] ss:$8 sps:$4 sm:$0xff]   ;;  %v1953_v59 = vld [vmem:[%s2738_s3 + $0xa0] ss:$16 sps:$4 sm:$0xff]  }
  0x29   :  { %864 = vmatprep.subr.bf16.mxu1 %v1887_v60  ;;  %v1534_v60 = vcombine.low %v2211_v47, %v2216_v48  ;;  %v1956_v47 = vld [vmem:[%s2738_s3 + $0xc0] ss:$16 sps:$4 sm:$0xff]   ;;  %v1961_v48 = vld [vmem:[%s2738_s3 + $0xe4] ss:$16 sps:$4 sm:$0xff]  }
  0x2b   :  { %912 = vmatpush1.bf16.msra.mxu0 %v1778_v24  ;;  %v1818_v24 = vld [vmem:[%s2736_s1 + $0x280] ss:$8 sps:$4 sm:$0xff]  }
  0x2c   :  { %913 = vmatprep.subr.bf16.mxu0 %v1779_v25  ;;  %865 = vmatpush1.bf16.msra.mxu1 %v1889_v63  ;;  %v1823_v25 = vld [vmem:[%s2736_s1 + $0x294] ss:$8 sps:$4 sm:$0xff]  }
  0x2d   :  { %866 = vmatprep.subr.bf16.mxu1 %v1893_v0  ;;  %v1856_v0 = vld [vmem:[%s2736_s1 + $0x314] ss:$8 sps:$4 sm:$0xff]  }
  0x2f   :  { %914 = vmatpush1.bf16.msra.mxu0 %v1781_v26  ;;  %v1925_v26 = vld [vmem:[%s2736_s1 + $0xe0] ss:$8 sps:$4 sm:$0xff]  }
  0x30   :  { %915 = vmatprep.subr.bf16.mxu0 %v1782_v29  ;;  %867 = vmatpush1.bf16.msra.mxu1 %v1895_v3  ;;  %v1826_v29 = vld [vmem:[%s2736_s1 + $0x2a4] ss:$8 sps:$4 sm:$0xff]   ;;  %v1959_v3 = vld [vmem:[%s2738_s3 + $0xe0] ss:$16 sps:$4 sm:$0xff]  }
  0x31   :  { %868 = vmatprep.subr.bf16.mxu1 %v1899_v4  ;;  %v1964_v4 = vld [vmem:[%s2738_s3 + $0x104] ss:$16 sps:$4 sm:$0xff]  }
  0x33   :  { %916 = vmatpush1.bf16.msra.mxu0 %v1784_v32  ;;  %v1824_v32 = vld [vmem:[%s2736_s1 + $0x2a0] ss:$8 sps:$4 sm:$0xff]  }
  0x34   :  { %917 = vmatprep.subr.bf16.mxu0 %v1785_v33  ;;  %869 = vmatpush1.bf16.msra.mxu1 %v1901_v7  ;;  %v1829_v33 = vld [vmem:[%s2736_s1 + $0x2b4] ss:$8 sps:$4 sm:$0xff]   ;;  %v1962_v7 = vld [vmem:[%s2738_s3 + $0x100] ss:$16 sps:$4 sm:$0xff]  }
  0x35   :  { %870 = vmatprep.subr.bf16.mxu1 %v1905_v8  ;;  %v1967_v8 = vld [vmem:[%s2738_s3 + $0x124] ss:$16 sps:$4 sm:$0xff]  }
  0x37   :  { %918 = vmatpush1.bf16.msra.mxu0 %v1787_v36  ;;  %v1938_v36 = vld [vmem:[%s2738_s3] ss:$16 sps:$4 sm:$0xff]  }
  0x38   :  { %919 = vmatprep.subr.bf16.mxu0 %v1788_v38  ;;  %871 = vmatpush1.bf16.msra.mxu1 %v1907_v11  ;;  %v1832_v38 = vld [vmem:[%s2736_s1 + $0x2c4] ss:$8 sps:$4 sm:$0xff]   ;;  %v1965_v11 = vld [vmem:[%s2738_s3 + $0x120] ss:$16 sps:$4 sm:$0xff]  }
  0x39   :  { %872 = vmatprep.subr.bf16.mxu1 %v1911_v14  ;;  %v1880_v14 = vld [vmem:[%s2736_s1 + $0x354] ss:$8 sps:$4 sm:$0xff]  }
  0x3b   :  { %920 = vmatpush1.bf16.msra.mxu0 %v1790_v41  ;;  %v1830_v41 = vld [vmem:[%s2736_s1 + $0x2c0] ss:$8 sps:$4 sm:$0xff]  }
  0x3c   :  { %921 = vmatprep.subr.bf16.mxu0 %v1791_v42  ;;  %873 = vmatpush1.bf16.msra.mxu1 %v1913_v18  ;;  %v1835_v42 = vld [vmem:[%s2736_s1 + $0x2d4] ss:$8 sps:$4 sm:$0xff]   ;;  %v1886_v18 = vld [vmem:[%s2736_s1 + $0x364] ss:$8 sps:$4 sm:$0xff]  }
  0x3d   :  { %874 = vmatprep.subr.bf16.mxu1 %v1917_v19  ;;  %v1971_v19 = vld [vmem:[%s2738_s3 + $0x160] ss:$16 sps:$4 sm:$0xff]  }
  0x3f   :  { %922 = vmatpush1.bf16.msra.mxu0 %v1793_v44  ;;  %v1949_v44 = vld [vmem:[%s2738_s3 + $0x64] ss:$16 sps:$4 sm:$0xff]  }
  0x40   :  { %934 = vmatprep.subr.bf16.mxu0 %v1796_v46  ;;  %875 = vmatpush1.bf16.msra.mxu1 %v1919_v22  ;;  %v1838_v46 = vld [vmem:[%s2736_s1 + $0x2e4] ss:$8 sps:$4 sm:$0xff]   ;;  %v1892_v22 = vld [vmem:[%s2736_s1 + $0x374] ss:$8 sps:$4 sm:$0xff]  }
  0x41   :  { %876 = vmatprep.subr.bf16.mxu1 %v1923_v23  ;;  %v1974_v23 = vld [vmem:[%s2738_s3 + $0x180] ss:$16 sps:$4 sm:$0xff]  }
  0x42   :  { %924 = vmatmul.mubr.bf16.vlgmr.msra.gmra.mrb[0].mxu0 %v1532_v50  ;;  %v1952_v50 = vld [vmem:[%s2738_s3 + $0x84] ss:$16 sps:$4 sm:$0xff]  }
  0x43   :  { %935 = vmatpush1.bf16.msra.mxu0 %v1794_v52  ;;  %966 = vmatprep.mubr.bf16.mxu0 %v1535_v53  ;;  %v1844_v52 = vld [vmem:[%s2736_s1 + $0x2f4] ss:$8 sps:$4 sm:$0xff]   ;;  %v1950_v53 = vld [vmem:[%s2738_s3 + $0x80] ss:$16 sps:$4 sm:$0xff]  }
  0x44   :  { %936 = vmatprep.subr.bf16.mxu0 %v1799_v54  ;;  %877 = vmatpush1.bf16.msra.mxu1 %v1925_v26  ;;  %v1955_v54 = vld [vmem:[%s2738_s3 + $0xa4] ss:$16 sps:$4 sm:$0xff]   ;;  %v1896_v26 = vld [vmem:[%s2736_s1 + $0x380] ss:$8 sps:$4 sm:$0xff]  }
  0x45   :  { %878 = vmatprep.subr.bf16.mxu1 %v1929_v27  ;;  %v1904_v27 = vld [vmem:[%s2736_s1 + $0x394] ss:$8 sps:$4 sm:$0xff]  }
  0x47   :  { %937 = vmatpush1.bf16.msra.mxu0 %v1797_v57  ;;  %v2423_v57 = vld [vmem:[%s2737_s0 + $0x18] sm:$0xff] }
  0x48   :  { %938 = vmatprep.subr.bf16.mxu0 %v1802_v58  ;;  %879 = vmatpush1.bf16.msra.mxu1 %v1931_v30  ;;  %v2428_v58 = vld [vmem:[%s2737_s0 + $0x38] sm:$0xff]  ;;  %v1908_v30 = vld [vmem:[%s2736_s1 + $0x3a0] ss:$8 sps:$4 sm:$0xff]  }
  0x49   :  { %1432 = vmatprep.subr.bf16.mxu1 %v1940_v31  ;;  %v1537_v63 = vcombine.high %v2423_v57, %v2428_v58  ;;  %v1916_v31 = vld [vmem:[%s2736_s1 + $0x3b4] ss:$8 sps:$4 sm:$0xff]  }
  0x4b   :  { %939 = vmatpush1.bf16.msra.mxu0 %v1800_v61  ;;  %881 = vmatmul.mubr.bf16.vlgmr.msra.gmra.mrb[0].mxu1 %v1530_v34  ;;  %v1958_v61 = vld [vmem:[%s2738_s3 + $0xc4] ss:$16 sps:$4 sm:$0xff]   ;;  %v1920_v34 = vld [vmem:[%s2736_s1 + $0x3c0] ss:$8 sps:$4 sm:$0xff]  }
  0x4c   :  { %940 = vmatprep.subr.bf16.mxu0 %v1805_v62  ;;  %1433 = vmatpush1.bf16.msra.mxu1 %v1938_v36  ;;  %v1848_v62 = vld [vmem:[%s2736_s1 + $0x300] ss:$8 sps:$4 sm:$0xff]   ;;  %v1926_v36 = vld [vmem:[%s2736_s1 + $0x3d0] ss:$8 sps:$4 sm:$0xff]  }
  0x4d   :  { %1434 = vmatprep.subr.bf16.mxu1 %v1943_v37  ;;  %v1934_v37 = vld [vmem:[%s2736_s1 + $0x3e4] ss:$8 sps:$4 sm:$0xff]  }
  0x4f   :  { %941 = vmatpush1.bf16.msra.mxu0 %v1803_v1  ;;  %v1854_v1 = vld [vmem:[%s2736_s1 + $0x310] ss:$8 sps:$4 sm:$0xff]  }
  0x50   :  { %942 = vmatprep.subr.bf16.mxu0 %v1808_v2  ;;  %1435 = vmatpush1.bf16.msra.mxu1 %v1941_v39  ;;  %v1862_v2 = vld [vmem:[%s2736_s1 + $0x324] ss:$8 sps:$4 sm:$0xff]   ;;  %v1937_v39 = vld [vmem:[%s2736_s1 + $0x3f4] ss:$8 sps:$4 sm:$0xff]  }
  0x51   :  { %1436 = vmatprep.subr.bf16.mxu1 %v1946_v40  ;;  %v1935_v40 = vld [vmem:[%s2736_s1 + $0x3f0] ss:$8 sps:$4 sm:$0xff]  }
  0x53   :  { %943 = vmatpush1.bf16.msra.mxu0 %v1806_v5  ;;  %v1860_v5 = vld [vmem:[%s2736_s1 + $0x320] ss:$8 sps:$4 sm:$0xff]  }
  0x54   :  { %944 = vmatprep.subr.bf16.mxu0 %v1811_v6  ;;  %1437 = vmatpush1.bf16.msra.mxu1 %v1944_v43  ;;  %v1868_v6 = vld [vmem:[%s2736_s1 + $0x334] ss:$8 sps:$4 sm:$0xff]  }
  0x55   :  { %1438 = vmatprep.subr.bf16.mxu1 %v1949_v44  ;;  %v1979_v43 = vld [vmem:[%s2738_s3 + $0x1a4] ss:$16 sps:$4 sm:$0xff]  }
  0x56   :  { %v1982_v44 = vld [vmem:[%s2738_s3 + $0x1c4] ss:$16 sps:$4 sm:$0xff]  }
  0x57   :  { %945 = vmatpush1.bf16.msra.mxu0 %v1809_v9  ;;  %v1866_v9 = vld [vmem:[%s2736_s1 + $0x330] ss:$8 sps:$4 sm:$0xff]  }
  0x58   :  { %946 = vmatprep.subr.bf16.mxu0 %v1814_v10  ;;  %1439 = vmatpush1.bf16.msra.mxu1 %v1947_v49  ;;  %v1874_v10 = vld [vmem:[%s2736_s1 + $0x344] ss:$8 sps:$4 sm:$0xff]   ;;  %v1983_v49 = vld [vmem:[%s2738_s3 + $0x1e0] ss:$16 sps:$4 sm:$0xff]  }
  0x59   :  { %1440 = vmatprep.subr.bf16.mxu1 %v1952_v50  ;;  %v1988_v50 = vld [vmem:[%s2738_s3 + $0xc] ss:$16 sps:$4 sm:$0xff]  }
  0x5b   :  { %947 = vmatpush1.bf16.msra.mxu0 %v1812_v16  ;;  %v1973_v16 = vld [vmem:[%s2738_s3 + $0x164] ss:$16 sps:$4 sm:$0xff]  }
  0x5c   :  { %948 = vmatprep.subr.bf16.mxu0 %v1817_v17  ;;  %1441 = vmatpush1.bf16.msra.mxu1 %v1950_v53  ;;  %v1878_v17 = vld [vmem:[%s2736_s1 + $0x350] ss:$8 sps:$4 sm:$0xff]  }
  0x5d   :  { %1442 = vmatprep.subr.bf16.mxu1 %v1955_v54 }
  0x5f   :  { %949 = vmatpush1.bf16.msra.mxu0 %v1815_v20  ;;  %v1976_v20 = vld [vmem:[%s2738_s3 + $0x184] ss:$16 sps:$4 sm:$0xff]  }
  0x60   :  { %950 = vmatprep.subr.bf16.mxu0 %v1820_v21  ;;  %1443 = vmatpush1.bf16.msra.mxu1 %v1953_v59  ;;  %v1884_v21 = vld [vmem:[%s2736_s1 + $0x360] ss:$8 sps:$4 sm:$0xff]  }
  0x61   :  { %1444 = vmatprep.subr.bf16.mxu1 %v1958_v61 }
  0x63   :  { %951 = vmatpush1.bf16.msra.mxu0 %v1818_v24  ;;  %v1890_v24 = vld [vmem:[%s2736_s1 + $0x370] ss:$8 sps:$4 sm:$0xff]  }
  0x64   :  { %952 = vmatprep.subr.bf16.mxu0 %v1823_v25  ;;  %1445 = vmatpush1.bf16.msra.mxu1 %v1956_v47  ;;  %v1898_v25 = vld [vmem:[%s2736_s1 + $0x384] ss:$8 sps:$4 sm:$0xff]  }
  0x65   :  { %1446 = vmatprep.subr.bf16.mxu1 %v1961_v48 }
  0x67   :  { %953 = vmatpush1.bf16.msra.mxu0 %v1821_v28  ;;  %v1902_v28 = vld [vmem:[%s2736_s1 + $0x390] ss:$8 sps:$4 sm:$0xff]  }
  0x68   :  { %954 = vmatprep.subr.bf16.mxu0 %v1826_v29  ;;  %1447 = vmatpush1.bf16.msra.mxu1 %v1959_v3  ;;  %v1910_v29 = vld [vmem:[%s2736_s1 + $0x3a4] ss:$8 sps:$4 sm:$0xff]  }
  0x69   :  { %1448 = vmatprep.subr.bf16.mxu1 %v1964_v4 }
  0x6b   :  { %955 = vmatpush1.bf16.msra.mxu0 %v1824_v32  ;;  %v1914_v32 = vld [vmem:[%s2736_s1 + $0x3b0] ss:$8 sps:$4 sm:$0xff]  }
  0x6c   :  { %956 = vmatprep.subr.bf16.mxu0 %v1829_v33  ;;  %1449 = vmatpush1.bf16.msra.mxu1 %v1962_v7  ;;  %v1922_v33 = vld [vmem:[%s2736_s1 + $0x3c4] ss:$8 sps:$4 sm:$0xff]  }
  0x6d   :  { %1450 = vmatprep.subr.bf16.mxu1 %v1967_v8 }
  0x6f   :  { %957 = vmatpush1.bf16.msra.mxu0 %v1827_v35  ;;  %v1928_v35 = vld [vmem:[%s2736_s1 + $0x3d4] ss:$8 sps:$4 sm:$0xff]  }
  0x70   :  { %958 = vmatprep.subr.bf16.mxu0 %v1832_v38  ;;  %1451 = vmatpush1.bf16.msra.mxu1 %v1965_v11  ;;  %v1932_v38 = vld [vmem:[%s2736_s1 + $0x3e0] ss:$8 sps:$4 sm:$0xff]  }
  0x71   :  { %1452 = vmatprep.subr.bf16.mxu1 %v1970_v12 }
  0x73   :  { %959 = vmatpush1.bf16.msra.mxu0 %v1830_v41  ;;  %v1536_v41 = vcombine.low %v2423_v57, %v2428_v58  ;;  %v156_v58 = vld [vmem:[%s2739_s2] sm:$0x3] }
  0x74   :  { %960 = vmatprep.subr.bf16.mxu0 %v1835_v42  ;;  %1453 = vmatpush1.bf16.msra.mxu1 %v1968_v15  ;;  %v1977_v42 = vld [vmem:[%s2738_s3 + $0x1a0] ss:$16 sps:$4 sm:$0xff]   ;;  %v1991_v15 = vld [vmem:[%s2738_s3 + $0x2c] ss:$16 sps:$4 sm:$0xff]  }
  0x75   :  { %1454 = vmatprep.subr.bf16.mxu1 %v1973_v16  ;;  %v1989_v16 = vld [vmem:[%s2738_s3 + $0x28] ss:$16 sps:$4 sm:$0xff]  }
  0x77   :  { %961 = vmatpush1.bf16.msra.mxu0 %v1833_v45  ;;  %v1980_v45 = vld [vmem:[%s2738_s3 + $0x1c0] ss:$16 sps:$4 sm:$0xff]  }
  0x78   :  { %962 = vmatprep.subr.bf16.mxu0 %v1838_v46  ;;  %1455 = vmatpush1.bf16.msra.mxu1 %v1971_v19  ;;  %v1985_v46 = vld [vmem:[%s2738_s3 + $0x1e4] ss:$16 sps:$4 sm:$0xff]   ;;  %v1997_v19 = vld [vmem:[%s2738_s3 + $0x6c] ss:$16 sps:$4 sm:$0xff]  }
  0x79   :  { %1456 = vmatprep.subr.bf16.mxu1 %v1976_v20  ;;  %v1995_v20 = vld [vmem:[%s2738_s3 + $0x68] ss:$16 sps:$4 sm:$0xff]  }
  0x7b   :  { %963 = vmatpush1.bf16.msra.mxu0 %v1836_v51 }
  0x7c   :  { %964 = vmatprep.subr.bf16.mxu0 %v1844_v52  ;;  %1457 = vmatpush1.bf16.msra.mxu1 %v1974_v23  ;;  %v2003_v23 = vld [vmem:[%s2738_s3 + $0xac] ss:$16 sps:$4 sm:$0xff]  }
  0x7d   :  { %1458 = vmatprep.subr.bf16.mxu1 %v1979_v43  ;;  %v2033_v43 = vld [vmem:[%s2738_s3 + $0x1ec] ss:$16 sps:$4 sm:$0xff]  }
  0x7f   :  { %965 = vmatpush1.bf16.msra.mxu0 %v1842_v55  ;;  %v158_v55 = vlaneseq }
  0x80   :  { %977 = vmatprep.subr.bf16.mxu0 %v1850_v56  ;;  %1459 = vmatpush1.bf16.msra.mxu1 %v1977_v42  ;;  %v2028_v42 = vld [vmem:[%s2738_s3 + $0x1c8] ss:$16 sps:$4 sm:$0xff]  }
  0x81   :  { %1460 = vmatprep.subr.bf16.mxu1 %v1982_v44  ;;  %v2595_v56 = vshrl.u32 %v158_v55, 7  ;;  %v2031_v44 = vld [vmem:[%s2738_s3 + $0x1e8] ss:$16 sps:$4 sm:$0xff]  }
  0x82   :  { %967 = vmatmul.mubr.bf16.vlgmr.msra.gmra.mrb[0].mxu0 %v1534_v60 }
  0x83   :  { %978 = vmatpush1.bf16.msra.mxu0 %v1848_v62  ;;  %1009 = vmatprep.mubr.bf16.mxu0 %v1537_v63  ;;  %v160_v57 = vsub.s32 0, %v2595_v56  ;;  %v164_v59 = vsub.s32 1, %v2595_v56 }
  0x84   :  { %979 = vmatprep.subr.bf16.mxu0 %v1856_v0  ;;  %1461 = vmatpush1.bf16.msra.mxu1 %v1980_v45  ;;  %v1090_v45 = vld [vmem:[%s2740_s4] sm:$0xf] }
  0x85   :  { %1462 = vmatprep.subr.bf16.mxu1 %v1985_v46  ;;  %v161_v60 = vrot.slane %v156_v58, %v160_v57  ;;  %v165_v61 = vrot.slane %v156_v58, %v164_v59  ;;  %v1095_v46 = vrot.slane %v1090_v45, %v160_v57  ;;  %v1102_v57 = vsub.s32 2, %v2595_v56 }
  0x87   :  { %980 = vmatpush1.bf16.msra.mxu0 %v1854_v1 }
  0x88   :  { %981 = vmatprep.subr.bf16.mxu0 %v1862_v2  ;;  %1463 = vmatpush1.bf16.msra.mxu1 %v1983_v49  ;;  %v1099_v49 = vrot.slane %v1090_v45, %v164_v59  ;;  %v1106_v59 = vsub.s32 3, %v2595_v56 }
  0x89   :  { %1475 = vmatprep.subr.bf16.mxu1 %v1988_v50 }
  0x8b   :  { %982 = vmatpush1.bf16.msra.mxu0 %v1860_v5 }
  0x8c   :  { %983 = vmatprep.subr.bf16.mxu0 %v1868_v6 }
  0x8f   :  { %984 = vmatpush1.bf16.msra.mxu0 %v1866_v9 }
  0x90   :  { %985 = vmatprep.subr.bf16.mxu0 %v1874_v10 }
  0x93   :  { %986 = vmatpush1.bf16.msra.mxu0 %v1872_v13 }
  0x94   :  { %987 = vmatprep.subr.bf16.mxu0 %v1880_v14  ;;  %v1986_v14 = vld [vmem:[%s2738_s3 + $0x8] ss:$16 sps:$4 sm:$0xff]  }
  0x97   :  { %988 = vmatpush1.bf16.msra.mxu0 %v1878_v17  ;;  %v1994_v17 = vld [vmem:[%s2738_s3 + $0x4c] ss:$16 sps:$4 sm:$0xff]  }
  0x98   :  { %989 = vmatprep.subr.bf16.mxu0 %v1886_v18  ;;  %v1992_v18 = vld [vmem:[%s2738_s3 + $0x48] ss:$16 sps:$4 sm:$0xff]  }
  0x9b   :  { %990 = vmatpush1.bf16.msra.mxu0 %v1884_v21  ;;  %v2000_v21 = vld [vmem:[%s2738_s3 + $0x8c] ss:$16 sps:$4 sm:$0xff]  }
  0x9c   :  { %991 = vmatprep.subr.bf16.mxu0 %v1892_v22  ;;  %v1998_v22 = vld [vmem:[%s2738_s3 + $0x88] ss:$16 sps:$4 sm:$0xff]  }
  0x9f   :  { %992 = vmatpush1.bf16.msra.mxu0 %v1890_v24  ;;  %v2001_v24 = vld [vmem:[%s2738_s3 + $0xa8] ss:$16 sps:$4 sm:$0xff]  }
  0xa0   :  { %993 = vmatprep.subr.bf16.mxu0 %v1898_v25  ;;  %v2006_v25 = vld [vmem:[%s2738_s3 + $0xcc] ss:$16 sps:$4 sm:$0xff]  }
  0xa3   :  { %994 = vmatpush1.bf16.msra.mxu0 %v1896_v26  ;;  %v2004_v26 = vld [vmem:[%s2738_s3 + $0xc8] ss:$16 sps:$4 sm:$0xff]  }
  0xa4   :  { %995 = vmatprep.subr.bf16.mxu0 %v1904_v27  ;;  %v2009_v27 = vld [vmem:[%s2738_s3 + $0xec] ss:$16 sps:$4 sm:$0xff]  }
  0xa7   :  { %996 = vmatpush1.bf16.msra.mxu0 %v1902_v28  ;;  %v2007_v28 = vld [vmem:[%s2738_s3 + $0xe8] ss:$16 sps:$4 sm:$0xff]  }
  0xa8   :  { %997 = vmatprep.subr.bf16.mxu0 %v1910_v29  ;;  %v2012_v29 = vld [vmem:[%s2738_s3 + $0x10c] ss:$16 sps:$4 sm:$0xff]  }
  0xab   :  { %998 = vmatpush1.bf16.msra.mxu0 %v1908_v30  ;;  %v2010_v30 = vld [vmem:[%s2738_s3 + $0x108] ss:$16 sps:$4 sm:$0xff]  }
  0xac   :  { %999 = vmatprep.subr.bf16.mxu0 %v1916_v31  ;;  %v2015_v31 = vld [vmem:[%s2738_s3 + $0x12c] ss:$16 sps:$4 sm:$0xff]  }
  0xaf   :  { %1000 = vmatpush1.bf16.msra.mxu0 %v1914_v32  ;;  %v2013_v32 = vld [vmem:[%s2738_s3 + $0x128] ss:$16 sps:$4 sm:$0xff]  }
  0xb0   :  { %1001 = vmatprep.subr.bf16.mxu0 %v1922_v33  ;;  %v2018_v33 = vld [vmem:[%s2738_s3 + $0x14c] ss:$16 sps:$4 sm:$0xff]  }
  0xb3   :  { %1002 = vmatpush1.bf16.msra.mxu0 %v1920_v34  ;;  %v2016_v34 = vld [vmem:[%s2738_s3 + $0x148] ss:$16 sps:$4 sm:$0xff]  }
  0xb4   :  { %1003 = vmatprep.subr.bf16.mxu0 %v1928_v35  ;;  %v2021_v35 = vld [vmem:[%s2738_s3 + $0x16c] ss:$16 sps:$4 sm:$0xff]  }
  0xb7   :  { %1004 = vmatpush1.bf16.msra.mxu0 %v1926_v36  ;;  %v2019_v36 = vld [vmem:[%s2738_s3 + $0x168] ss:$16 sps:$4 sm:$0xff]  }
  0xb8   :  { %1005 = vmatprep.subr.bf16.mxu0 %v1934_v37  ;;  %v2024_v37 = vld [vmem:[%s2738_s3 + $0x18c] ss:$16 sps:$4 sm:$0xff]  }
  0xbb   :  { %1006 = vmatpush1.bf16.msra.mxu0 %v1932_v38  ;;  %v2022_v38 = vld [vmem:[%s2738_s3 + $0x188] ss:$16 sps:$4 sm:$0xff]  }
  0xbc   :  { %1007 = vmatprep.subr.bf16.mxu0 %v1937_v39  ;;  %v2027_v39 = vld [vmem:[%s2738_s3 + $0x1ac] ss:$16 sps:$4 sm:$0xff]  }
  0xbf   :  { %1008 = vmatpush1.bf16.msra.mxu0 %v1935_v40  ;;  %v2025_v40 = vld [vmem:[%s2738_s3 + $0x1a8] ss:$16 sps:$4 sm:$0xff]  }
  0xc2   :  { %1010 = vmatmul.mubr.bf16.vlgmr.msra.gmra.mrb[0].mxu0 %v1536_v41  ;;  %v2030_v41 = vld [vmem:[%s2738_s3 + $0x1cc] ss:$16 sps:$4 sm:$0xff]  }
 0x11e   :  { %v882_v51 = vpop.f32.mrb[0].mxu1 }
 0x11f   :  { %v884_v52 = vpop.f32.mrb[1].mxu1  ;;  %v883_v62 = vadd.f32 %v882_v51, %v161_v60 }
 0x120   :  { %v886_v53 = vpop.f32.mrb[2].mxu1  ;;  %v885_v63 = vadd.f32 %v884_v52, %v165_v61 }
 0x121   :  { %v888_v54 = vpop.f32.mrb[3].mxu1  ;;  %v887_v47 = vadd.f32 %v886_v53, %v161_v60 }
 0x122   :  { %v889_v2 = vadd.f32 %v888_v54, %v165_v61  ;;  %v1103_v61 = vrot.slane %v1090_v45, %v1102_v57 }
 0x195   :  { %v1011_v0 = vpop.f32.mrb[0].mxu0 }
 0x196   :  { %v1731_v48 = vadd.f32 %v1011_v0, %v883_v62  ;;  %v1013_v1 = vpop.f32.mrb[1].mxu0  ;;  %v1107_v62 = vrot.slane %v1090_v45, %v1106_v59 }
 0x197   :  { %v1733_v3 = vadd.f32 %v1013_v1, %v885_v63  ;;  %v1015_v4 = vpop.f32.mrb[2].mxu0 }
 0x198   :  { %v1735_v5 = vadd.f32 %v1015_v4, %v887_v47  ;;  %v1017_v6 = vpop.f32.mrb[3].mxu0  ;;  %v1020_v8 = vmax.f32 %v1731_v48, 0.0 }
 0x199   :  { %v1737_v7 = vadd.f32 %v1017_v6, %v889_v2  ;;  %v1021_v10 = vmax.f32 %v1733_v3, 0.0 }
 0x19a   :  { %v1022_v9 = vmax.f32 %v1735_v5, 0.0 }
 0x19b   :  { %v1023_v11 = vmax.f32 %v1737_v7, 0.0 }
 0x19c   :  { %v2606_v12 = vpack.c.bf16 %v1022_v9, %v1020_v8 }
 0x19d   :  { %v1025_v13 = vpack.c.bf16 %v1023_v11, %v1021_v10 }
 0x19f   :  { %1464 = vmatprep.mubr.bf16.mxu1 %v1025_v13 }
 0x1a0   :  { %1465 = vmatmul.mubr.bf16.vlgmr.msra.gmra.mrb[4].mxu1 %v2606_v12 }
 0x1a1   :  { %1476 = vmatpush1.bf16.msra.mxu1 %v1986_v14  ;;  %1507 = vmatprep.mubr.bf16.mxu1 %v1025_v13 }
 0x1a2   :  { %1477 = vmatprep.subr.bf16.mxu1 %v1991_v15 }
 0x1a5   :  { %1478 = vmatpush1.bf16.msra.mxu1 %v1989_v16 }
 0x1a6   :  { %1479 = vmatprep.subr.bf16.mxu1 %v1994_v17 }
 0x1a9   :  { %1480 = vmatpush1.bf16.msra.mxu1 %v1992_v18 }
 0x1aa   :  { %1481 = vmatprep.subr.bf16.mxu1 %v1997_v19 }
 0x1ad   :  { %1482 = vmatpush1.bf16.msra.mxu1 %v1995_v20 }
 0x1ae   :  { %1483 = vmatprep.subr.bf16.mxu1 %v2000_v21 }
 0x1b1   :  { %1484 = vmatpush1.bf16.msra.mxu1 %v1998_v22 }
 0x1b2   :  { %1485 = vmatprep.subr.bf16.mxu1 %v2003_v23 }
 0x1b5   :  { %1486 = vmatpush1.bf16.msra.mxu1 %v2001_v24 }
 0x1b6   :  { %1487 = vmatprep.subr.bf16.mxu1 %v2006_v25 }
 0x1b9   :  { %1488 = vmatpush1.bf16.msra.mxu1 %v2004_v26 }
 0x1ba   :  { %1489 = vmatprep.subr.bf16.mxu1 %v2009_v27 }
 0x1bd   :  { %1490 = vmatpush1.bf16.msra.mxu1 %v2007_v28 }
 0x1be   :  { %1491 = vmatprep.subr.bf16.mxu1 %v2012_v29 }
 0x1c1   :  { %1492 = vmatpush1.bf16.msra.mxu1 %v2010_v30 }
 0x1c2   :  { %1493 = vmatprep.subr.bf16.mxu1 %v2015_v31 }
 0x1c5   :  { %1494 = vmatpush1.bf16.msra.mxu1 %v2013_v32 }
 0x1c6   :  { %1495 = vmatprep.subr.bf16.mxu1 %v2018_v33 }
 0x1c9   :  { %1496 = vmatpush1.bf16.msra.mxu1 %v2016_v34 }
 0x1ca   :  { %1497 = vmatprep.subr.bf16.mxu1 %v2021_v35 }
 0x1cd   :  { %1498 = vmatpush1.bf16.msra.mxu1 %v2019_v36 }
 0x1ce   :  { %1499 = vmatprep.subr.bf16.mxu1 %v2024_v37 }
 0x1d1   :  { %1500 = vmatpush1.bf16.msra.mxu1 %v2022_v38 }
 0x1d2   :  { %1501 = vmatprep.subr.bf16.mxu1 %v2027_v39 }
 0x1d5   :  { %1502 = vmatpush1.bf16.msra.mxu1 %v2025_v40 }
 0x1d6   :  { %1503 = vmatprep.subr.bf16.mxu1 %v2030_v41 }
 0x1d9   :  { %1504 = vmatpush1.bf16.msra.mxu1 %v2028_v42 }
 0x1da   :  { %1505 = vmatprep.subr.bf16.mxu1 %v2033_v43 }
 0x1dd   :  { %1506 = vmatpush1.bf16.msra.mxu1 %v2031_v44 }
 0x1e0   :  { %1508 = vmatmul.mubr.bf16.vlgmr.msra.gmra.mrb[8].mxu1 %v2606_v12 }
 0x273   :  { %v1466_v50 = vpop.f32.mrb[4].mxu1 }
 0x274   :  { %v1467_v51 = vadd.f32 %v1466_v50, %v1095_v46  ;;  %v1468_v52 = vpop.f32.mrb[5].mxu1 }
 0x275   :  { %v1469_v53 = vadd.f32 %v1468_v52, %v1099_v49  ;;  %v1470_v54 = vpop.f32.mrb[6].mxu1 }
 0x276   :  { %1518 = vst [vmem:[%s2741_s5] sm:$0xff] %v1467_v51  ;;  %v1471_v55 = vadd.f32 %v1470_v54, %v1095_v46  ;;  %v1472_v58 = vpop.f32.mrb[7].mxu1 }
 0x277   :  { %1519 = vst [vmem:[%s2741_s5 + $0x8] sm:$0xff] %v1469_v53  ;;  %v1473_v60 = vadd.f32 %v1472_v58, %v1099_v49 }
 0x278   :  { %1522 = vst [vmem:[%s2741_s5 + $0x20] sm:$0xff] %v1471_v55 }
 0x279   :  { %1523 = vst [vmem:[%s2741_s5 + $0x28] sm:$0xff] %v1473_v60 }
 0x2b3   :  { %v1509_v63 = vpop.f32.mrb[8].mxu1 }
 0x2b4   :  { %v1510_v0 = vadd.f32 %v1509_v63, %v1103_v61  ;;  %v1511_v47 = vpop.f32.mrb[9].mxu1 }
 0x2b5   :  { %v1512_v48 = vadd.f32 %v1511_v47, %v1107_v62  ;;  %v1513_v1 = vpop.f32.mrb[10].mxu1 }
 0x2b6   :  { %1520 = vst [vmem:[%s2741_s5 + $0x10] sm:$0xff] %v1510_v0  ;;  %v1514_v2 = vadd.f32 %v1513_v1, %v1103_v61  ;;  %v1515_v3 = vpop.f32.mrb[11].mxu1 }
 0x2b7   :  { %1521 = vst [vmem:[%s2741_s5 + $0x18] sm:$0xff] %v1512_v48  ;;  %v1516_v4 = vadd.f32 %v1515_v3, %v1107_v62 }
 0x2b8   :  { %1524 = vst [vmem:[%s2741_s5 + $0x30] sm:$0xff] %v1514_v2 }
 0x2b9   :  { %1525 = vst [vmem:[%s2741_s5 + $0x38] sm:$0xff] %v1516_v4 }

</bundles_post_ra>
